<compile_context>
chip_gen: v6e
topology: v6e:2x2x1
jax: 0.10.0
libtpu: 0.0.40
codegen_flags: <defaults>
</compile_context>

<pallas_src>
import functools
import math

import jax
import jax.numpy as jnp
from jax.experimental import pallas as pl
from jax.experimental.pallas import tpu as pltpu


# ---------------------------------------------------------------------------
# helpers
# ---------------------------------------------------------------------------
def _pick_tile(dim, target, align):
    """Largest tile <= target that divides `dim` and is a multiple of `align`;
    falls back to the full dim (full-extent blocks are always legal)."""
    t = min(target, dim)
    t -= t % align
    while t >= align:
        if dim % t == 0:
            return t
        t -= align
    return dim


def _gelu(x):
    # tanh-approximate GELU (matches jax.nn.gelu default).
    c = 0.7978845608028654  # sqrt(2/pi)
    return 0.5 * x * (1.0 + jnp.tanh(c * (x + 0.044715 * x * x * x)))


# ---------------------------------------------------------------------------
# Pallas kernels
# ---------------------------------------------------------------------------
def _ln_linear_kernel(x_ref, g_ref, bt_ref, w_ref, bias_ref, o_ref, *, eps, apply_gelu):
    """LayerNorm over the feature dim, then matmul with a full-K weight block."""
    x = x_ref[...].astype(jnp.float32)                       # [TM, K]
    mu = jnp.mean(x, axis=-1, keepdims=True)
    xc = x - mu
    var = jnp.mean(xc * xc, axis=-1, keepdims=True)
    h = xc * jax.lax.rsqrt(var + eps)
    h = h * g_ref[...].astype(jnp.float32) + bt_ref[...].astype(jnp.float32)
    y = jnp.dot(h, w_ref[...].astype(jnp.float32),
                preferred_element_type=jnp.float32)          # [TM, TF]
    y = y + bias_ref[...].astype(jnp.float32)
    if apply_gelu:
        y = _gelu(y)
    o_ref[...] = y.astype(o_ref.dtype)


def _attn_proj_res_kernel(qkv_ref, w_ref, b_ref, r_ref, o_ref, *, num_heads, scale):
    """Per-batch multi-head attention + output projection + bias + residual."""
    qkv = qkv_ref[0].astype(jnp.float32)                     # [N, 3*D]
    n, three_d = qkv.shape
    d = three_d // 3
    dh = d // num_heads

    heads = []
    for h in range(num_heads):                               # unrolled at trace time
        q = qkv[:, h * dh:(h + 1) * dh]                      # [N, Dh]
        k = qkv[:, d + h * dh: d + (h + 1) * dh]             # [N, Dh]
        v = qkv[:, 2 * d + h * dh: 2 * d + (h + 1) * dh]     # [N, Dh]
        # q @ k^T without materializing the transpose (contract last dims).
        s = jax.lax.dot_general(q, k, (((1,), (1,)), ((), ())),
                                preferred_element_type=jnp.float32) * scale
        m = jnp.max(s, axis=-1, keepdims=True)
        p = jnp.exp(s - m)
        p = p / jnp.sum(p, axis=-1, keepdims=True)
        heads.append(jnp.dot(p, v, preferred_element_type=jnp.float32))

    o = jnp.concatenate(heads, axis=-1)                      # [N, D]
    y = jnp.dot(o, w_ref[...].astype(jnp.float32),
                preferred_element_type=jnp.float32)          # proj
    y = y + b_ref[...].astype(jnp.float32) + r_ref[0].astype(jnp.float32)
    o_ref[0] = y.astype(o_ref.dtype)


def _linear_residual_kernel(x_ref, w_ref, b_ref, r_ref, o_ref, acc_ref):
    @pl.when(pl.program_id(2) == 0)
    def _():
        acc_ref[...] = jnp.zeros_like(acc_ref)

    acc_ref[...] += jnp.dot(x_ref[...], w_ref[...],
                            preferred_element_type=jnp.float32)

    @pl.when(pl.program_id(2) == pl.num_programs(2) - 1)
    def _():
        y = acc_ref[...] + b_ref[...].astype(jnp.float32) + r_ref[...].astype(jnp.float32)
        o_ref[...] = y.astype(o_ref.dtype)


# ---------------------------------------------------------------------------
# pallas_call wrappers
# ---------------------------------------------------------------------------
def ln_linear(x, gamma, beta, w, b=None, apply_gelu=False, eps=1e-5, tm=256, tf=512):
    """y = (optional GELU)( LayerNorm(x) @ w + b ), fused in one kernel."""
    M, K = x.shape
    _, F = w.shape
    TM = _pick_tile(M, tm, 8)
    TF = _pick_tile(F, tf, 128)
    if b is None:
        b = jnp.zeros((F,), x.dtype)                         # qkv_bias=False path
    return pl.pallas_call(
        functools.partial(_ln_linear_kernel, eps=float(eps), apply_gelu=apply_gelu),
        out_shape=jax.ShapeDtypeStruct((M, F), x.dtype),
        grid_spec=pltpu.PrefetchScalarGridSpec(
            num_scalar_prefetch=0,
            grid=(M // TM, F // TF),
            in_specs=[
                pl.BlockSpec((TM, K), lambda i, j: (i, 0)),
                pl.BlockSpec((1, K), lambda i, j: (0, 0)),
                pl.BlockSpec((1, K), lambda i, j: (0, 0)),
                pl.BlockSpec((K, TF), lambda i, j: (0, j)),
                pl.BlockSpec((1, TF), lambda i, j: (0, j)),
            ],
            out_specs=pl.BlockSpec((TM, TF), lambda i, j: (i, j)),
        ),
        compiler_params=pltpu.CompilerParams(
            dimension_semantics=("parallel", "parallel")),
    )(x, gamma.reshape(1, K), beta.reshape(1, K), w, b.reshape(1, F))


def attention_proj_residual(qkv, w_proj, b_proj, residual, B, N, num_heads, scale):
    """out = residual + proj(multi_head_attention(qkv)) ; qkv is [B*N, 3*D]."""
    M, three_d = qkv.shape
    D = three_d // 3
    qkv3 = qkv.reshape(B, N, three_d)                        # free reshape (row-major)
    res3 = residual.reshape(B, N, D)
    out = pl.pallas_call(
        functools.partial(_attn_proj_res_kernel,
                          num_heads=num_heads, scale=float(scale)),
        out_shape=jax.ShapeDtypeStruct((B, N, D), residual.dtype),
        grid_spec=pltpu.PrefetchScalarGridSpec(
            num_scalar_prefetch=0,
            grid=(B,),
            in_specs=[
                pl.BlockSpec((1, N, three_d), lambda b: (b, 0, 0)),
                pl.BlockSpec((D, D), lambda b: (0, 0)),
                pl.BlockSpec((1, D), lambda b: (0, 0)),
                pl.BlockSpec((1, N, D), lambda b: (b, 0, 0)),
            ],
            out_specs=pl.BlockSpec((1, N, D), lambda b: (b, 0, 0)),
        ),
        compiler_params=pltpu.CompilerParams(dimension_semantics=("parallel",)),
    )(qkv3, w_proj, b_proj.reshape(1, D), res3)
    return out.reshape(M, D)


def linear_residual(x, w, b, residual, tm=256, tf=512, tk=512):
    """out = residual + (x @ w + b), K-tiled with an f32 VMEM accumulator."""
    M, K = x.shape
    _, F = w.shape
    TM = _pick_tile(M, tm, 8)
    TF = _pick_tile(F, tf, 128)
    TK = _pick_tile(K, tk, 128)
    return pl.pallas_call(
        _linear_residual_kernel,
        out_shape=jax.ShapeDtypeStruct((M, F), x.dtype),
        grid_spec=pltpu.PrefetchScalarGridSpec(
            num_scalar_prefetch=0,
            grid=(M // TM, F // TF, K // TK),
            in_specs=[
                pl.BlockSpec((TM, TK), lambda i, j, k: (i, k)),
                pl.BlockSpec((TK, TF), lambda i, j, k: (k, j)),
                pl.BlockSpec((1, TF), lambda i, j, k: (0, j)),
                pl.BlockSpec((TM, TF), lambda i, j, k: (i, j)),
            ],
            out_specs=pl.BlockSpec((TM, TF), lambda i, j, k: (i, j)),
            scratch_shapes=[pltpu.VMEM((TM, TF), jnp.float32)],
        ),
        compiler_params=pltpu.CompilerParams(
            dimension_semantics=("parallel", "parallel", "arbitrary")),
    )(x, w, b.reshape(1, F), residual)


# ---------------------------------------------------------------------------
# Block / decoder forward (orchestration; reshapes are layout plumbing only)
# ---------------------------------------------------------------------------
def block_forward(x, p, num_heads):
    B, N, D = x.shape
    M = B * N
    Dh = D // num_heads
    scale = Dh ** (-0.5)

    x2 = x.reshape(M, D)

    # ---- x = x + Attention(LayerNorm1(x)) ----
    qkv = ln_linear(x2, p["ln1_g"], p["ln1_b"], p["w_qkv"], None)      # LN1 + QKV matmul
    x2 = attention_proj_residual(qkv, p["w_proj"], p["b_proj"], x2,
                                 B, N, num_heads, scale)               # MHA + proj + residual

    # ---- x = x + Mlp(LayerNorm2(x)) ----
    h = ln_linear(x2, p["ln2_g"], p["ln2_b"], p["w_fc1"], p["b_fc1"],
                  apply_gelu=True)                                     # LN2 + fc1 + GELU
    x2 = linear_residual(h, p["w_fc2"], p["b_fc2"], x2)                # fc2 + residual

    return x2.reshape(B, N, D)


def transformer_decoder_forward(x, blocks, num_heads):
    for p in blocks:
        x = block_forward(x, p, num_heads)
    return x


# ---------------------------------------------------------------------------
# Pure-JAX reference (mirrors the PyTorch module in eval mode)
# ---------------------------------------------------------------------------
def _layer_norm_ref(x, g, b, eps=1e-5):
    mu = jnp.mean(x, axis=-1, keepdims=True)
    var = jnp.mean(jnp.square(x - mu), axis=-1, keepdims=True)
    return (x - mu) * jax.lax.rsqrt(var + eps) * g + b


def _reference_forward(x, blocks, num_heads):
    B, N, D = x.shape
    Dh = D // num_heads
    scale = Dh ** (-0.5)
    for p in blocks:
        h = _layer_norm_ref(x, p["ln1_g"], p["ln1_b"])
        qkv = (h @ p["w_qkv"]).reshape(B, N, 3, num_heads, Dh).transpose(2, 0, 3, 1, 4)
        q, k, v = qkv[0], qkv[1], qkv[2]
        attn = jax.nn.softmax(jnp.einsum("bhqd,bhkd->bhqk", q, k) * scale, axis=-1)
        o = jnp.einsum("bhqk,bhkd->bhqd", attn, v).transpose(0, 2, 1, 3).reshape(B, N, D)
        x = x + (o @ p["w_proj"] + p["b_proj"])
        h = _layer_norm_ref(x, p["ln2_g"], p["ln2_b"])
        h = _gelu(h @ p["w_fc1"] + p["b_fc1"])
        x = x + (h @ p["w_fc2"] + p["b_fc2"])
    return x


# ---------------------------------------------------------------------------
# parameter init (xavier_uniform weights, zero biases, unit LayerNorm — matches
# TransformerDecoder._init_weights)
# ---------------------------------------------------------------------------
def _xavier_uniform(key, fan_in, fan_out, dtype=jnp.float32):
    limit = math.sqrt(6.0 / (fan_in + fan_out))
    return jax.random.uniform(key, (fan_in, fan_out), dtype, -limit, limit)


def init_params(key, dim, depth, mlp_ratio):
    hidden = int(dim * mlp_ratio)
    blocks = []
    for _ in range(depth):
        key, k1, k2, k3, k4 = jax.random.split(key, 5)
        blocks.append(dict(
            ln1_g=jnp.ones((dim,), jnp.float32),
            ln1_b=jnp.zeros((dim,), jnp.float32),
            w_qkv=_xavier_uniform(k1, dim, 3 * dim),
            w_proj=_xavier_uniform(k2, dim, dim),
            b_proj=jnp.zeros((dim,), jnp.float32),
            ln2_g=jnp.ones((dim,), jnp.float32),
            ln2_b=jnp.zeros((dim,), jnp.float32),
            w_fc1=_xavier_uniform(k3, dim, hidden),
            b_fc1=jnp.zeros((hidden,), jnp.float32),
            w_fc2=_xavier_uniform(k4, hidden, dim),
            b_fc2=jnp.zeros((dim,), jnp.float32),
        ))
    return blocks, key


# ---------------------------------------------------------------------------
if __name__ == "__main__":
    key = jax.random.PRNGKey(0)

    # small shapes consistent with the module (embed_dim divisible by num_heads=3)
    B, N = 2, 16
    embed_dim, depth, num_heads, mlp_ratio = 96, 2, 3, 0.5

    blocks, key = init_params(key, embed_dim, depth, mlp_ratio)
    key, xk = jax.random.split(key)
    x = jax.random.normal(xk, (B, N, embed_dim), dtype=jnp.float32)

    fwd = jax.jit(functools.partial(transformer_decoder_forward, num_heads=num_heads))
    out = fwd(x, blocks)
    jax.block_until_ready(out)

    ref = _reference_forward(x, blocks, num_heads)
    assert out.shape == ref.shape, (out.shape, ref.shape)
    assert bool(jnp.all(jnp.isfinite(out)))
    max_err = float(jnp.max(jnp.abs(out - ref)))
    assert jnp.allclose(out, ref, rtol=2e-3, atol=2e-3), max_err

    print("KERNEL_OK")
</pallas_src>

<mosaic_0001>
module attributes {stable_mosaic.version = 11 : i64} {
  func.func @_attn_proj_res_kernel(%arg0: i32, %arg1: memref<1x16x288xf32, #tpu.memory_space<vmem>>, %arg2: memref<96x96xf32, #tpu.memory_space<vmem>>, %arg3: memref<1x96xf32, #tpu.memory_space<vmem>>, %arg4: memref<1x16x96xf32, #tpu.memory_space<vmem>>, %arg5: memref<1x16x96xf32, #tpu.memory_space<vmem>>) attributes {dimension_semantics = [#tpu.dimension_semantics<parallel>], iteration_bounds = array<i64: 2>, scalar_prefetch = 0 : i64, scratch_operands = 0 : i64, tpu.core_type = #tpu.core_type<tc>, window_params = [{transform_indices = @transform_0, window_bounds = array<i64: 1, 16, 288>}, {pipeline_mode = #tpu.pipeline_mode<synchronous>, transform_indices = @transform_1, window_bounds = array<i64: 96, 96>}, {pipeline_mode = #tpu.pipeline_mode<synchronous>, transform_indices = @transform_2, window_bounds = array<i64: 1, 96>}, {transform_indices = @transform_3, window_bounds = array<i64: 1, 16, 96>}, {transform_indices = @transform_4, window_bounds = array<i64: 1, 16, 96>}]} {
    %c0 = arith.constant 0 : index
    %c0_0 = arith.constant 0 : index
    %c0_1 = arith.constant 0 : index
    %0 = vector.load %arg1[%c0, %c0_0, %c0_1] : memref<1x16x288xf32, #tpu.memory_space<vmem>>, vector<1x16x288xf32>
    %1 = vector.shape_cast %0 : vector<1x16x288xf32> to vector<16x288xf32>
    %2 = vector.extract_strided_slice %1 {offsets = [0, 0], sizes = [16, 32], strides = [1, 1]} : vector<16x288xf32> to vector<16x32xf32>
    %3 = vector.extract_strided_slice %1 {offsets = [0, 96], sizes = [16, 32], strides = [1, 1]} : vector<16x288xf32> to vector<16x32xf32>
    %4 = vector.extract_strided_slice %1 {offsets = [0, 192], sizes = [16, 32], strides = [1, 1]} : vector<16x288xf32> to vector<16x32xf32>
    %cst = arith.constant dense<0.000000e+00> : vector<16x16xf32>
    %5 = tpu.matmul %2, %3, %cst {dimension_numbers = #tpu.dot_dimension_numbers<[1], [1], [0], [0], [0, 0, 1, 0], [], []>} : vector<16x32xf32>, vector<16x32xf32>, vector<16x16xf32> -> vector<16x16xf32>
    %cst_2 = arith.constant 0.176776692 : f32
    %6 = vector.broadcast %cst_2 : f32 to vector<16x16xf32>
    %7 = arith.mulf %5, %6 : vector<16x16xf32>
    %cst_3 = arith.constant dense<0xFF800000> : vector<16xf32>
    %8 = vector.multi_reduction <maximumf>, %7, %cst_3 [1] : vector<16x16xf32> to vector<16xf32>
    %9 = vector.shape_cast %8 : vector<16xf32> to vector<16x1xf32>
    %10 = vector.broadcast %9 : vector<16x1xf32> to vector<16x16xf32>
    %11 = arith.subf %7, %10 : vector<16x16xf32>
    %12 = math.exp %11 : vector<16x16xf32>
    %cst_4 = arith.constant dense<0.000000e+00> : vector<16xf32>
    %13 = vector.multi_reduction <add>, %12, %cst_4 [1] : vector<16x16xf32> to vector<16xf32>
    %14 = vector.shape_cast %13 : vector<16xf32> to vector<16x1xf32>
    %15 = vector.broadcast %14 : vector<16x1xf32> to vector<16x16xf32>
    %16 = arith.divf %12, %15 : vector<16x16xf32>
    %cst_5 = arith.constant dense<0.000000e+00> : vector<16x32xf32>
    %17 = tpu.matmul %16, %4, %cst_5 {dimension_numbers = #tpu.dot_dimension_numbers<[1], [0], [0], [1], [0, 0, 1, 1], [], []>} : vector<16x16xf32>, vector<16x32xf32>, vector<16x32xf32> -> vector<16x32xf32>
    %18 = vector.extract_strided_slice %1 {offsets = [0, 32], sizes = [16, 32], strides = [1, 1]} : vector<16x288xf32> to vector<16x32xf32>
    %19 = vector.extract_strided_slice %1 {offsets = [0, 128], sizes = [16, 32], strides = [1, 1]} : vector<16x288xf32> to vector<16x32xf32>
    %20 = vector.extract_strided_slice %1 {offsets = [0, 224], sizes = [16, 32], strides = [1, 1]} : vector<16x288xf32> to vector<16x32xf32>
    %cst_6 = arith.constant dense<0.000000e+00> : vector<16x16xf32>
    %21 = tpu.matmul %18, %19, %cst_6 {dimension_numbers = #tpu.dot_dimension_numbers<[1], [1], [0], [0], [0, 0, 1, 0], [], []>} : vector<16x32xf32>, vector<16x32xf32>, vector<16x16xf32> -> vector<16x16xf32>
    %cst_7 = arith.constant 0.176776692 : f32
    %22 = vector.broadcast %cst_7 : f32 to vector<16x16xf32>
    %23 = arith.mulf %21, %22 : vector<16x16xf32>
    %cst_8 = arith.constant dense<0xFF800000> : vector<16xf32>
    %24 = vector.multi_reduction <maximumf>, %23, %cst_8 [1] : vector<16x16xf32> to vector<16xf32>
    %25 = vector.shape_cast %24 : vector<16xf32> to vector<16x1xf32>
    %26 = vector.broadcast %25 : vector<16x1xf32> to vector<16x16xf32>
    %27 = arith.subf %23, %26 : vector<16x16xf32>
    %28 = math.exp %27 : vector<16x16xf32>
    %cst_9 = arith.constant dense<0.000000e+00> : vector<16xf32>
    %29 = vector.multi_reduction <add>, %28, %cst_9 [1] : vector<16x16xf32> to vector<16xf32>
    %30 = vector.shape_cast %29 : vector<16xf32> to vector<16x1xf32>
    %31 = vector.broadcast %30 : vector<16x1xf32> to vector<16x16xf32>
    %32 = arith.divf %28, %31 : vector<16x16xf32>
    %cst_10 = arith.constant dense<0.000000e+00> : vector<16x32xf32>
    %33 = tpu.matmul %32, %20, %cst_10 {dimension_numbers = #tpu.dot_dimension_numbers<[1], [0], [0], [1], [0, 0, 1, 1], [], []>} : vector<16x16xf32>, vector<16x32xf32>, vector<16x32xf32> -> vector<16x32xf32>
    %34 = vector.extract_strided_slice %1 {offsets = [0, 64], sizes = [16, 32], strides = [1, 1]} : vector<16x288xf32> to vector<16x32xf32>
    %35 = vector.extract_strided_slice %1 {offsets = [0, 160], sizes = [16, 32], strides = [1, 1]} : vector<16x288xf32> to vector<16x32xf32>
    %36 = vector.extract_strided_slice %1 {offsets = [0, 256], sizes = [16, 32], strides = [1, 1]} : vector<16x288xf32> to vector<16x32xf32>
    %cst_11 = arith.constant dense<0.000000e+00> : vector<16x16xf32>
    %37 = tpu.matmul %34, %35, %cst_11 {dimension_numbers = #tpu.dot_dimension_numbers<[1], [1], [0], [0], [0, 0, 1, 0], [], []>} : vector<16x32xf32>, vector<16x32xf32>, vector<16x16xf32> -> vector<16x16xf32>
    %cst_12 = arith.constant 0.176776692 : f32
    %38 = vector.broadcast %cst_12 : f32 to vector<16x16xf32>
    %39 = arith.mulf %37, %38 : vector<16x16xf32>
    %cst_13 = arith.constant dense<0xFF800000> : vector<16xf32>
    %40 = vector.multi_reduction <maximumf>, %39, %cst_13 [1] : vector<16x16xf32> to vector<16xf32>
    %41 = vector.shape_cast %40 : vector<16xf32> to vector<16x1xf32>
    %42 = vector.broadcast %41 : vector<16x1xf32> to vector<16x16xf32>
    %43 = arith.subf %39, %42 : vector<16x16xf32>
    %44 = math.exp %43 : vector<16x16xf32>
    %cst_14 = arith.constant dense<0.000000e+00> : vector<16xf32>
    %45 = vector.multi_reduction <add>, %44, %cst_14 [1] : vector<16x16xf32> to vector<16xf32>
    %46 = vector.shape_cast %45 : vector<16xf32> to vector<16x1xf32>
    %47 = vector.broadcast %46 : vector<16x1xf32> to vector<16x16xf32>
    %48 = arith.divf %44, %47 : vector<16x16xf32>
    %cst_15 = arith.constant dense<0.000000e+00> : vector<16x32xf32>
    %49 = tpu.matmul %48, %36, %cst_15 {dimension_numbers = #tpu.dot_dimension_numbers<[1], [0], [0], [1], [0, 0, 1, 1], [], []>} : vector<16x16xf32>, vector<16x32xf32>, vector<16x32xf32> -> vector<16x32xf32>
    %50 = tpu.concatenate %17, %33, %49 in 1 : vector<16x32xf32>, vector<16x32xf32>, vector<16x32xf32> -> vector<16x96xf32>
    %c0_16 = arith.constant 0 : index
    %c0_17 = arith.constant 0 : index
    %51 = vector.load %arg2[%c0_16, %c0_17] : memref<96x96xf32, #tpu.memory_space<vmem>>, vector<96x96xf32>
    %cst_18 = arith.constant dense<0.000000e+00> : vector<16x96xf32>
    %52 = tpu.matmul %50, %51, %cst_18 {dimension_numbers = #tpu.dot_dimension_numbers<[1], [0], [0], [1], [0, 0, 1, 1], [], []>} : vector<16x96xf32>, vector<96x96xf32>, vector<16x96xf32> -> vector<16x96xf32>
    %c0_19 = arith.constant 0 : index
    %c0_20 = arith.constant 0 : index
    %53 = vector.load %arg3[%c0_19, %c0_20] : memref<1x96xf32, #tpu.memory_space<vmem>>, vector<1x96xf32>
    %54 = vector.broadcast %53 : vector<1x96xf32> to vector<16x96xf32>
    %55 = arith.addf %52, %54 : vector<16x96xf32>
    %c0_21 = arith.constant 0 : index
    %c0_22 = arith.constant 0 : index
    %c0_23 = arith.constant 0 : index
    %56 = vector.load %arg4[%c0_21, %c0_22, %c0_23] : memref<1x16x96xf32, #tpu.memory_space<vmem>>, vector<1x16x96xf32>
    %57 = vector.shape_cast %56 : vector<1x16x96xf32> to vector<16x96xf32>
    %58 = arith.addf %55, %57 : vector<16x96xf32>
    %c0_24 = arith.constant 0 : index
    %c0_25 = arith.constant 0 : index
    %c0_26 = arith.constant 0 : index
    %59 = vector.load %arg5[%c0_24, %c0_25, %c0_26] : memref<1x16x96xf32, #tpu.memory_space<vmem>>, vector<1x16x96xf32>
    %60 = vector.shape_cast %59 : vector<1x16x96xf32> to vector<16x96xf32>
    %61 = vector.shape_cast %58 : vector<16x96xf32> to vector<1x16x96xf32>
    tpu.vector_store %arg5[%c0_24, %c0_25, %c0_26], %61 {strides = array<i32>} : memref<1x16x96xf32, #tpu.memory_space<vmem>>, vector<1x16x96xf32>,
    return
  }
  func.func @transform_0(%arg0: i32) -> (i32, i32, i32) {
    %c0_i32 = arith.constant 0 : i32
    %c0_i32_0 = arith.constant 0 : i32
    %c0_i32_1 = arith.constant 0 : i32
    return %arg0, %c0_i32, %c0_i32_0 : i32, i32, i32
  }
  func.func @transform_1(%arg0: i32) -> (i32, i32) {
    %c0_i32 = arith.constant 0 : i32
    %c0_i32_0 = arith.constant 0 : i32
    %c0_i32_1 = arith.constant 0 : i32
    return %c0_i32, %c0_i32_0 : i32, i32
  }
  func.func @transform_2(%arg0: i32) -> (i32, i32) {
    %c0_i32 = arith.constant 0 : i32
    %c0_i32_0 = arith.constant 0 : i32
    %c0_i32_1 = arith.constant 0 : i32
    return %c0_i32, %c0_i32_0 : i32, i32
  }
  func.func @transform_3(%arg0: i32) -> (i32, i32, i32) {
    %c0_i32 = arith.constant 0 : i32
    %c0_i32_0 = arith.constant 0 : i32
    %c0_i32_1 = arith.constant 0 : i32
    return %arg0, %c0_i32, %c0_i32_0 : i32, i32, i32
  }
  func.func @transform_4(%arg0: i32) -> (i32, i32, i32) {
    %c0_i32 = arith.constant 0 : i32
    %c0_i32_0 = arith.constant 0 : i32
    %c0_i32_1 = arith.constant 0 : i32
    return %arg0, %c0_i32, %c0_i32_0 : i32, i32, i32
  }
}

module attributes {stable_mosaic.version = 11 : i64} {
  func.func @_ln_linear_kernel(%arg0: i32, %arg1: i32, %arg2: memref<32x96xf32, #tpu.memory_space<vmem>>, %arg3: memref<1x96xf32, #tpu.memory_space<vmem>>, %arg4: memref<1x96xf32, #tpu.memory_space<vmem>>, %arg5: memref<96x288xf32, #tpu.memory_space<vmem>>, %arg6: memref<1x288xf32, #tpu.memory_space<vmem>>, %arg7: memref<32x288xf32, #tpu.memory_space<vmem>>) attributes {dimension_semantics = [#tpu.dimension_semantics<parallel>, #tpu.dimension_semantics<parallel>], iteration_bounds = array<i64: 1, 1>, scalar_prefetch = 0 : i64, scratch_operands = 0 : i64, tpu.core_type = #tpu.core_type<tc>, window_params = [{transform_indices = @transform_0, window_bounds = array<i64: 32, 96>}, {pipeline_mode = #tpu.pipeline_mode<synchronous>, transform_indices = @transform_1, window_bounds = array<i64: 1, 96>}, {pipeline_mode = #tpu.pipeline_mode<synchronous>, transform_indices = @transform_2, window_bounds = array<i64: 1, 96>}, {transform_indices = @transform_3, window_bounds = array<i64: 96, 288>}, {transform_indices = @transform_4, window_bounds = array<i64: 1, 288>}, {transform_indices = @transform_5, window_bounds = array<i64: 32, 288>}]} {
    %c0 = arith.constant 0 : index
    %c0_0 = arith.constant 0 : index
    %0 = vector.load %arg2[%c0, %c0_0] : memref<32x96xf32, #tpu.memory_space<vmem>>, vector<32x96xf32>
    %cst = arith.constant dense<0.000000e+00> : vector<32xf32>
    %1 = vector.multi_reduction <add>, %0, %cst [1] : vector<32x96xf32> to vector<32xf32>
    %2 = vector.shape_cast %1 : vector<32xf32> to vector<32x1xf32>
    %cst_1 = arith.constant 9.600000e+01 : f32
    %3 = vector.broadcast %cst_1 : f32 to vector<32x1xf32>
    %4 = arith.divf %2, %3 : vector<32x1xf32>
    %5 = vector.broadcast %4 : vector<32x1xf32> to vector<32x96xf32>
    %6 = arith.subf %0, %5 : vector<32x96xf32>
    %7 = arith.mulf %6, %6 : vector<32x96xf32>
    %cst_2 = arith.constant dense<0.000000e+00> : vector<32xf32>
    %8 = vector.multi_reduction <add>, %7, %cst_2 [1] : vector<32x96xf32> to vector<32xf32>
    %9 = vector.shape_cast %8 : vector<32xf32> to vector<32x1xf32>
    %cst_3 = arith.constant 9.600000e+01 : f32
    %10 = vector.broadcast %cst_3 : f32 to vector<32x1xf32>
    %11 = arith.divf %9, %10 : vector<32x1xf32>
    %cst_4 = arith.constant 9.99999974E-6 : f32
    %12 = vector.broadcast %cst_4 : f32 to vector<32x1xf32>
    %13 = arith.addf %11, %12 : vector<32x1xf32>
    %14 = math.rsqrt %13 : vector<32x1xf32>
    %15 = vector.broadcast %14 : vector<32x1xf32> to vector<32x96xf32>
    %16 = arith.mulf %6, %15 : vector<32x96xf32>
    %c0_5 = arith.constant 0 : index
    %c0_6 = arith.constant 0 : index
    %17 = vector.load %arg3[%c0_5, %c0_6] : memref<1x96xf32, #tpu.memory_space<vmem>>, vector<1x96xf32>
    %18 = vector.broadcast %17 : vector<1x96xf32> to vector<32x96xf32>
    %19 = arith.mulf %16, %18 : vector<32x96xf32>
    %c0_7 = arith.constant 0 : index
    %c0_8 = arith.constant 0 : index
    %20 = vector.load %arg4[%c0_7, %c0_8] : memref<1x96xf32, #tpu.memory_space<vmem>>, vector<1x96xf32>
    %21 = vector.broadcast %20 : vector<1x96xf32> to vector<32x96xf32>
    %22 = arith.addf %19, %21 : vector<32x96xf32>
    %c0_9 = arith.constant 0 : index
    %c0_10 = arith.constant 0 : index
    %23 = vector.load %arg5[%c0_9, %c0_10] : memref<96x288xf32, #tpu.memory_space<vmem>>, vector<96x288xf32>
    %cst_11 = arith.constant dense<0.000000e+00> : vector<32x288xf32>
    %24 = tpu.matmul %22, %23, %cst_11 {dimension_numbers = #tpu.dot_dimension_numbers<[1], [0], [0], [1], [0, 0, 1, 1], [], []>} : vector<32x96xf32>, vector<96x288xf32>, vector<32x288xf32> -> vector<32x288xf32>
    %c0_12 = arith.constant 0 : index
    %c0_13 = arith.constant 0 : index
    %25 = vector.load %arg6[%c0_12, %c0_13] : memref<1x288xf32, #tpu.memory_space<vmem>>, vector<1x288xf32>
    %26 = vector.broadcast %25 : vector<1x288xf32> to vector<32x288xf32>
    %27 = arith.addf %24, %26 : vector<32x288xf32>
    %c0_14 = arith.constant 0 : index
    %c0_15 = arith.constant 0 : index
    %28 = vector.load %arg7[%c0_14, %c0_15] : memref<32x288xf32, #tpu.memory_space<vmem>>, vector<32x288xf32>
    tpu.vector_store %arg7[%c0_14, %c0_15], %27 {strides = array<i32>} : memref<32x288xf32, #tpu.memory_space<vmem>>, vector<32x288xf32>,
    return
  }
  func.func @transform_0(%arg0: i32, %arg1: i32) -> (i32, i32) {
    %c0_i32 = arith.constant 0 : i32
    %c0_i32_0 = arith.constant 0 : i32
    return %arg0, %c0_i32 : i32, i32
  }
  func.func @transform_1(%arg0: i32, %arg1: i32) -> (i32, i32) {
    %c0_i32 = arith.constant 0 : i32
    %c0_i32_0 = arith.constant 0 : i32
    %c0_i32_1 = arith.constant 0 : i32
    return %c0_i32, %c0_i32_0 : i32, i32
  }
  func.func @transform_2(%arg0: i32, %arg1: i32) -> (i32, i32) {
    %c0_i32 = arith.constant 0 : i32
    %c0_i32_0 = arith.constant 0 : i32
    %c0_i32_1 = arith.constant 0 : i32
    return %c0_i32, %c0_i32_0 : i32, i32
  }
  func.func @transform_3(%arg0: i32, %arg1: i32) -> (i32, i32) {
    %c0_i32 = arith.constant 0 : i32
    %c0_i32_0 = arith.constant 0 : i32
    return %c0_i32, %arg1 : i32, i32
  }
  func.func @transform_4(%arg0: i32, %arg1: i32) -> (i32, i32) {
    %c0_i32 = arith.constant 0 : i32
    %c0_i32_0 = arith.constant 0 : i32
    return %c0_i32, %arg1 : i32, i32
  }
  func.func @transform_5(%arg0: i32, %arg1: i32) -> (i32, i32) {
    %c0_i32 = arith.constant 0 : i32
    return %arg0, %arg1 : i32, i32
  }
}

module attributes {stable_mosaic.version = 11 : i64} {
  func.func @_ln_linear_kernel(%arg0: i32, %arg1: i32, %arg2: memref<32x96xf32, #tpu.memory_space<vmem>>, %arg3: memref<1x96xf32, #tpu.memory_space<vmem>>, %arg4: memref<1x96xf32, #tpu.memory_space<vmem>>, %arg5: memref<96x48xf32, #tpu.memory_space<vmem>>, %arg6: memref<1x48xf32, #tpu.memory_space<vmem>>, %arg7: memref<32x48xf32, #tpu.memory_space<vmem>>) attributes {dimension_semantics = [#tpu.dimension_semantics<parallel>, #tpu.dimension_semantics<parallel>], iteration_bounds = array<i64: 1, 1>, scalar_prefetch = 0 : i64, scratch_operands = 0 : i64, tpu.core_type = #tpu.core_type<tc>, window_params = [{transform_indices = @transform_0, window_bounds = array<i64: 32, 96>}, {pipeline_mode = #tpu.pipeline_mode<synchronous>, transform_indices = @transform_1, window_bounds = array<i64: 1, 96>}, {pipeline_mode = #tpu.pipeline_mode<synchronous>, transform_indices = @transform_2, window_bounds = array<i64: 1, 96>}, {transform_indices = @transform_3, window_bounds = array<i64: 96, 48>}, {transform_indices = @transform_4, window_bounds = array<i64: 1, 48>}, {transform_indices = @transform_5, window_bounds = array<i64: 32, 48>}]} {
    %c0 = arith.constant 0 : index
    %c0_0 = arith.constant 0 : index
    %0 = vector.load %arg2[%c0, %c0_0] : memref<32x96xf32, #tpu.memory_space<vmem>>, vector<32x96xf32>
    %cst = arith.constant dense<0.000000e+00> : vector<32xf32>
    %1 = vector.multi_reduction <add>, %0, %cst [1] : vector<32x96xf32> to vector<32xf32>
    %2 = vector.shape_cast %1 : vector<32xf32> to vector<32x1xf32>
    %cst_1 = arith.constant 9.600000e+01 : f32
    %3 = vector.broadcast %cst_1 : f32 to vector<32x1xf32>
    %4 = arith.divf %2, %3 : vector<32x1xf32>
    %5 = vector.broadcast %4 : vector<32x1xf32> to vector<32x96xf32>
    %6 = arith.subf %0, %5 : vector<32x96xf32>
    %7 = arith.mulf %6, %6 : vector<32x96xf32>
    %cst_2 = arith.constant dense<0.000000e+00> : vector<32xf32>
    %8 = vector.multi_reduction <add>, %7, %cst_2 [1] : vector<32x96xf32> to vector<32xf32>
    %9 = vector.shape_cast %8 : vector<32xf32> to vector<32x1xf32>
    %cst_3 = arith.constant 9.600000e+01 : f32
    %10 = vector.broadcast %cst_3 : f32 to vector<32x1xf32>
    %11 = arith.divf %9, %10 : vector<32x1xf32>
    %cst_4 = arith.constant 9.99999974E-6 : f32
    %12 = vector.broadcast %cst_4 : f32 to vector<32x1xf32>
    %13 = arith.addf %11, %12 : vector<32x1xf32>
    %14 = math.rsqrt %13 : vector<32x1xf32>
    %15 = vector.broadcast %14 : vector<32x1xf32> to vector<32x96xf32>
    %16 = arith.mulf %6, %15 : vector<32x96xf32>
    %c0_5 = arith.constant 0 : index
    %c0_6 = arith.constant 0 : index
    %17 = vector.load %arg3[%c0_5, %c0_6] : memref<1x96xf32, #tpu.memory_space<vmem>>, vector<1x96xf32>
    %18 = vector.broadcast %17 : vector<1x96xf32> to vector<32x96xf32>
    %19 = arith.mulf %16, %18 : vector<32x96xf32>
    %c0_7 = arith.constant 0 : index
    %c0_8 = arith.constant 0 : index
    %20 = vector.load %arg4[%c0_7, %c0_8] : memref<1x96xf32, #tpu.memory_space<vmem>>, vector<1x96xf32>
    %21 = vector.broadcast %20 : vector<1x96xf32> to vector<32x96xf32>
    %22 = arith.addf %19, %21 : vector<32x96xf32>
    %c0_9 = arith.constant 0 : index
    %c0_10 = arith.constant 0 : index
    %23 = vector.load %arg5[%c0_9, %c0_10] : memref<96x48xf32, #tpu.memory_space<vmem>>, vector<96x48xf32>
    %cst_11 = arith.constant dense<0.000000e+00> : vector<32x48xf32>
    %24 = tpu.matmul %22, %23, %cst_11 {dimension_numbers = #tpu.dot_dimension_numbers<[1], [0], [0], [1], [0, 0, 1, 1], [], []>} : vector<32x96xf32>, vector<96x48xf32>, vector<32x48xf32> -> vector<32x48xf32>
    %c0_12 = arith.constant 0 : index
    %c0_13 = arith.constant 0 : index
    %25 = vector.load %arg6[%c0_12, %c0_13] : memref<1x48xf32, #tpu.memory_space<vmem>>, vector<1x48xf32>
    %26 = vector.broadcast %25 : vector<1x48xf32> to vector<32x48xf32>
    %27 = arith.addf %24, %26 : vector<32x48xf32>
    %cst_14 = arith.constant 5.000000e-01 : f32
    %28 = vector.broadcast %cst_14 : f32 to vector<32x48xf32>
    %29 = arith.mulf %28, %27 : vector<32x48xf32>
    %cst_15 = arith.constant 4.471500e-02 : f32
    %30 = vector.broadcast %cst_15 : f32 to vector<32x48xf32>
    %31 = arith.mulf %30, %27 : vector<32x48xf32>
    %32 = arith.mulf %31, %27 : vector<32x48xf32>
    %33 = arith.mulf %32, %27 : vector<32x48xf32>
    %34 = arith.addf %27, %33 : vector<32x48xf32>
    %cst_16 = arith.constant 0.797884583 : f32
    %35 = vector.broadcast %cst_16 : f32 to vector<32x48xf32>
    %36 = arith.mulf %35, %34 : vector<32x48xf32>
    %37 = math.tanh %36 : vector<32x48xf32>
    %cst_17 = arith.constant 1.000000e+00 : f32
    %38 = vector.broadcast %cst_17 : f32 to vector<32x48xf32>
    %39 = arith.addf %38, %37 : vector<32x48xf32>
    %40 = arith.mulf %29, %39 : vector<32x48xf32>
    %c0_18 = arith.constant 0 : index
    %c0_19 = arith.constant 0 : index
    %41 = vector.load %arg7[%c0_18, %c0_19] : memref<32x48xf32, #tpu.memory_space<vmem>>, vector<32x48xf32>
    tpu.vector_store %arg7[%c0_18, %c0_19], %40 {strides = array<i32>} : memref<32x48xf32, #tpu.memory_space<vmem>>, vector<32x48xf32>,
    return
  }
  func.func @transform_0(%arg0: i32, %arg1: i32) -> (i32, i32) {
    %c0_i32 = arith.constant 0 : i32
    %c0_i32_0 = arith.constant 0 : i32
    return %arg0, %c0_i32 : i32, i32
  }
  func.func @transform_1(%arg0: i32, %arg1: i32) -> (i32, i32) {
    %c0_i32 = arith.constant 0 : i32
    %c0_i32_0 = arith.constant 0 : i32
    %c0_i32_1 = arith.constant 0 : i32
    return %c0_i32, %c0_i32_0 : i32, i32
  }
  func.func @transform_2(%arg0: i32, %arg1: i32) -> (i32, i32) {
    %c0_i32 = arith.constant 0 : i32
    %c0_i32_0 = arith.constant 0 : i32
    %c0_i32_1 = arith.constant 0 : i32
    return %c0_i32, %c0_i32_0 : i32, i32
  }
  func.func @transform_3(%arg0: i32, %arg1: i32) -> (i32, i32) {
    %c0_i32 = arith.constant 0 : i32
    %c0_i32_0 = arith.constant 0 : i32
    return %c0_i32, %arg1 : i32, i32
  }
  func.func @transform_4(%arg0: i32, %arg1: i32) -> (i32, i32) {
    %c0_i32 = arith.constant 0 : i32
    %c0_i32_0 = arith.constant 0 : i32
    return %c0_i32, %arg1 : i32, i32
  }
  func.func @transform_5(%arg0: i32, %arg1: i32) -> (i32, i32) {
    %c0_i32 = arith.constant 0 : i32
    return %arg0, %arg1 : i32, i32
  }
}

module attributes {stable_mosaic.version = 11 : i64} {
  func.func @_linear_residual_kernel(%arg0: i32, %arg1: i32, %arg2: i32, %arg3: memref<32x48xf32, #tpu.memory_space<vmem>>, %arg4: memref<48x96xf32, #tpu.memory_space<vmem>>, %arg5: memref<1x96xf32, #tpu.memory_space<vmem>>, %arg6: memref<32x96xf32, #tpu.memory_space<vmem>>, %arg7: memref<32x96xf32, #tpu.memory_space<vmem>>, %arg8: memref<32x96xf32, #tpu.memory_space<vmem>>) attributes {dimension_semantics = [#tpu.dimension_semantics<parallel>, #tpu.dimension_semantics<parallel>, #tpu.dimension_semantics<arbitrary>], iteration_bounds = array<i64: 1, 1, 1>, scalar_prefetch = 0 : i64, scratch_operands = 1 : i64, tpu.core_type = #tpu.core_type<tc>, window_params = [{transform_indices = @transform_0, window_bounds = array<i64: 32, 48>}, {transform_indices = @transform_1, window_bounds = array<i64: 48, 96>}, {transform_indices = @transform_2, window_bounds = array<i64: 1, 96>}, {transform_indices = @transform_3, window_bounds = array<i64: 32, 96>}, {transform_indices = @transform_4, window_bounds = array<i64: 32, 96>}]} {
    %c0_i32 = arith.constant 0 : i32
    %0 = arith.cmpi eq, %arg2, %c0_i32 : i32
    %1 = arith.extui %0 : i1 to i32
    %c0_i32_0 = arith.constant 0 : i32
    %2 = arith.cmpi ne, %1, %c0_i32_0 : i32
    scf.if %2 {
      %cst_10 = arith.constant 0.000000e+00 : f32
      %12 = vector.broadcast %cst_10 : f32 to vector<32x96xf32>
      %c0_11 = arith.constant 0 : index
      %c0_12 = arith.constant 0 : index
      %13 = vector.load %arg8[%c0_11, %c0_12] : memref<32x96xf32, #tpu.memory_space<vmem>>, vector<32x96xf32>
      tpu.vector_store %arg8[%c0_11, %c0_12], %12 {strides = array<i32>} : memref<32x96xf32, #tpu.memory_space<vmem>>, vector<32x96xf32>,
    } else {
    }
    %c0 = arith.constant 0 : index
    %c0_1 = arith.constant 0 : index
    %3 = vector.load %arg8[%c0, %c0_1] : memref<32x96xf32, #tpu.memory_space<vmem>>, vector<32x96xf32>
    %c0_2 = arith.constant 0 : index
    %c0_3 = arith.constant 0 : index
    %4 = vector.load %arg3[%c0_2, %c0_3] : memref<32x48xf32, #tpu.memory_space<vmem>>, vector<32x48xf32>
    %c0_4 = arith.constant 0 : index
    %c0_5 = arith.constant 0 : index
    %5 = vector.load %arg4[%c0_4, %c0_5] : memref<48x96xf32, #tpu.memory_space<vmem>>, vector<48x96xf32>
    %cst = arith.constant dense<0.000000e+00> : vector<32x96xf32>
    %6 = tpu.matmul %4, %5, %cst {dimension_numbers = #tpu.dot_dimension_numbers<[1], [0], [0], [1], [0, 0, 1, 1], [], []>} : vector<32x48xf32>, vector<48x96xf32>, vector<32x96xf32> -> vector<32x96xf32>
    %7 = arith.addf %3, %6 : vector<32x96xf32>
    %c0_6 = arith.constant 0 : index
    %c0_7 = arith.constant 0 : index
    %8 = vector.load %arg8[%c0_6, %c0_7] : memref<32x96xf32, #tpu.memory_space<vmem>>, vector<32x96xf32>
    tpu.vector_store %arg8[%c0_6, %c0_7], %7 {strides = array<i32>} : memref<32x96xf32, #tpu.memory_space<vmem>>, vector<32x96xf32>,
    %c0_i32_8 = arith.constant 0 : i32
    %9 = arith.cmpi eq, %arg2, %c0_i32_8 : i32
    %10 = arith.extui %9 : i1 to i32
    %c0_i32_9 = arith.constant 0 : i32
    %11 = arith.cmpi ne, %10, %c0_i32_9 : i32
    scf.if %11 {
      %c0_10 = arith.constant 0 : index
      %c0_11 = arith.constant 0 : index
      %12 = vector.load %arg8[%c0_10, %c0_11] : memref<32x96xf32, #tpu.memory_space<vmem>>, vector<32x96xf32>
      %c0_12 = arith.constant 0 : index
      %c0_13 = arith.constant 0 : index
      %13 = vector.load %arg5[%c0_12, %c0_13] : memref<1x96xf32, #tpu.memory_space<vmem>>, vector<1x96xf32>
      %14 = vector.broadcast %13 : vector<1x96xf32> to vector<32x96xf32>
      %15 = arith.addf %12, %14 : vector<32x96xf32>
      %c0_14 = arith.constant 0 : index
      %c0_15 = arith.constant 0 : index
      %16 = vector.load %arg6[%c0_14, %c0_15] : memref<32x96xf32, #tpu.memory_space<vmem>>, vector<32x96xf32>
      %17 = arith.addf %15, %16 : vector<32x96xf32>
      %c0_16 = arith.constant 0 : index
      %c0_17 = arith.constant 0 : index
      %18 = vector.load %arg7[%c0_16, %c0_17] : memref<32x96xf32, #tpu.memory_space<vmem>>, vector<32x96xf32>
      tpu.vector_store %arg7[%c0_16, %c0_17], %17 {strides = array<i32>} : memref<32x96xf32, #tpu.memory_space<vmem>>, vector<32x96xf32>,
    } else {
    }
    return
  }
  func.func @transform_0(%arg0: i32, %arg1: i32, %arg2: i32) -> (i32, i32) {
    %c0_i32 = arith.constant 0 : i32
    return %arg0, %arg2 : i32, i32
  }
  func.func @transform_1(%arg0: i32, %arg1: i32, %arg2: i32) -> (i32, i32) {
    %c0_i32 = arith.constant 0 : i32
    return %arg2, %arg1 : i32, i32
  }
  func.func @transform_2(%arg0: i32, %arg1: i32, %arg2: i32) -> (i32, i32) {
    %c0_i32 = arith.constant 0 : i32
    %c0_i32_0 = arith.constant 0 : i32
    return %c0_i32, %arg1 : i32, i32
  }
  func.func @transform_3(%arg0: i32, %arg1: i32, %arg2: i32) -> (i32, i32) {
    %c0_i32 = arith.constant 0 : i32
    return %arg0, %arg1 : i32, i32
  }
  func.func @transform_4(%arg0: i32, %arg1: i32, %arg2: i32) -> (i32, i32) {
    %c0_i32 = arith.constant 0 : i32
    return %arg0, %arg1 : i32, i32
  }
}

module attributes {stable_mosaic.version = 11 : i64} {
  func.func @_linear_residual_kernel(%arg0: i32, %arg1: i32, %arg2: i32, %arg3: memref<32x48xf32, #tpu.memory_space<vmem>>, %arg4: memref<48x96xf32, #tpu.memory_space<vmem>>, %arg5: memref<1x96xf32, #tpu.memory_space<vmem>>, %arg6: memref<32x96xf32, #tpu.memory_space<vmem>>, %arg7: memref<32x96xf32, #tpu.memory_space<vmem>>, %arg8: memref<32x96xf32, #tpu.memory_space<vmem>>) attributes {dimension_semantics = [#tpu.dimension_semantics<parallel>, #tpu.dimension_semantics<parallel>, #tpu.dimension_semantics<arbitrary>], iteration_bounds = array<i64: 1, 1, 1>, scalar_prefetch = 0 : i64, scratch_operands = 1 : i64, tpu.core_type = #tpu.core_type<tc>, window_params = [{transform_indices = @transform_0, window_bounds = array<i64: 32, 48>}, {transform_indices = @transform_1, window_bounds = array<i64: 48, 96>}, {transform_indices = @transform_2, window_bounds = array<i64: 1, 96>}, {transform_indices = @transform_3, window_bounds = array<i64: 32, 96>}, {transform_indices = @transform_4, window_bounds = array<i64: 32, 96>}]} {
    %c0_i32 = arith.constant 0 : i32
    %0 = arith.cmpi eq, %arg2, %c0_i32 : i32
    %1 = arith.extui %0 : i1 to i32
    %c0_i32_0 = arith.constant 0 : i32
    %2 = arith.cmpi ne, %1, %c0_i32_0 : i32
    scf.if %2 {
      %cst_10 = arith.constant 0.000000e+00 : f32
      %12 = vector.broadcast %cst_10 : f32 to vector<32x96xf32>
      %c0_11 = arith.constant 0 : index
      %c0_12 = arith.constant 0 : index
      %13 = vector.load %arg8[%c0_11, %c0_12] : memref<32x96xf32, #tpu.memory_space<vmem>>, vector<32x96xf32>
      tpu.vector_store %arg8[%c0_11, %c0_12], %12 {strides = array<i32>} : memref<32x96xf32, #tpu.memory_space<vmem>>, vector<32x96xf32>,
    } else {
    }
    %c0 = arith.constant 0 : index
    %c0_1 = arith.constant 0 : index
    %3 = vector.load %arg8[%c0, %c0_1] : memref<32x96xf32, #tpu.memory_space<vmem>>, vector<32x96xf32>
    %c0_2 = arith.constant 0 : index
    %c0_3 = arith.constant 0 : index
    %4 = vector.load %arg3[%c0_2, %c0_3] : memref<32x48xf32, #tpu.memory_space<vmem>>, vector<32x48xf32>
    %c0_4 = arith.constant 0 : index
    %c0_5 = arith.constant 0 : index
    %5 = vector.load %arg4[%c0_4, %c0_5] : memref<48x96xf32, #tpu.memory_space<vmem>>, vector<48x96xf32>
    %cst = arith.constant dense<0.000000e+00> : vector<32x96xf32>
    %6 = tpu.matmul %4, %5, %cst {dimension_numbers = #tpu.dot_dimension_numbers<[1], [0], [0], [1], [0, 0, 1, 1], [], []>} : vector<32x48xf32>, vector<48x96xf32>, vector<32x96xf32> -> vector<32x96xf32>
    %7 = arith.addf %3, %6 : vector<32x96xf32>
    %c0_6 = arith.constant 0 : index
    %c0_7 = arith.constant 0 : index
    %8 = vector.load %arg8[%c0_6, %c0_7] : memref<32x96xf32, #tpu.memory_space<vmem>>, vector<32x96xf32>
    tpu.vector_store %arg8[%c0_6, %c0_7], %7 {strides = array<i32>} : memref<32x96xf32, #tpu.memory_space<vmem>>, vector<32x96xf32>,
    %c0_i32_8 = arith.constant 0 : i32
    %9 = arith.cmpi eq, %arg2, %c0_i32_8 : i32
    %10 = arith.extui %9 : i1 to i32
    %c0_i32_9 = arith.constant 0 : i32
    %11 = arith.cmpi ne, %10, %c0_i32_9 : i32
    scf.if %11 {
      %c0_10 = arith.constant 0 : index
      %c0_11 = arith.constant 0 : index
      %12 = vector.load %arg8[%c0_10, %c0_11] : memref<32x96xf32, #tpu.memory_space<vmem>>, vector<32x96xf32>
      %c0_12 = arith.constant 0 : index
      %c0_13 = arith.constant 0 : index
      %13 = vector.load %arg5[%c0_12, %c0_13] : memref<1x96xf32, #tpu.memory_space<vmem>>, vector<1x96xf32>
      %14 = vector.broadcast %13 : vector<1x96xf32> to vector<32x96xf32>
      %15 = arith.addf %12, %14 : vector<32x96xf32>
      %c0_14 = arith.constant 0 : index
      %c0_15 = arith.constant 0 : index
      %16 = vector.load %arg6[%c0_14, %c0_15] : memref<32x96xf32, #tpu.memory_space<vmem>>, vector<32x96xf32>
      %17 = arith.addf %15, %16 : vector<32x96xf32>
      %c0_16 = arith.constant 0 : index
      %c0_17 = arith.constant 0 : index
      %18 = vector.load %arg7[%c0_16, %c0_17] : memref<32x96xf32, #tpu.memory_space<vmem>>, vector<32x96xf32>
      tpu.vector_store %arg7[%c0_16, %c0_17], %17 {strides = array<i32>} : memref<32x96xf32, #tpu.memory_space<vmem>>, vector<32x96xf32>,
    } else {
    }
    return
  }
  func.func @transform_0(%arg0: i32, %arg1: i32, %arg2: i32) -> (i32, i32) {
    %c0_i32 = arith.constant 0 : i32
    return %arg0, %arg2 : i32, i32
  }
  func.func @transform_1(%arg0: i32, %arg1: i32, %arg2: i32) -> (i32, i32) {
    %c0_i32 = arith.constant 0 : i32
    return %arg2, %arg1 : i32, i32
  }
  func.func @transform_2(%arg0: i32, %arg1: i32, %arg2: i32) -> (i32, i32) {
    %c0_i32 = arith.constant 0 : i32
    %c0_i32_0 = arith.constant 0 : i32
    return %c0_i32, %arg1 : i32, i32
  }
  func.func @transform_3(%arg0: i32, %arg1: i32, %arg2: i32) -> (i32, i32) {
    %c0_i32 = arith.constant 0 : i32
    return %arg0, %arg1 : i32, i32
  }
  func.func @transform_4(%arg0: i32, %arg1: i32, %arg2: i32) -> (i32, i32) {
    %c0_i32 = arith.constant 0 : i32
    return %arg0, %arg1 : i32, i32
  }
}

module attributes {stable_mosaic.version = 11 : i64} {
  func.func @_ln_linear_kernel(%arg0: i32, %arg1: i32, %arg2: memref<32x96xf32, #tpu.memory_space<vmem>>, %arg3: memref<1x96xf32, #tpu.memory_space<vmem>>, %arg4: memref<1x96xf32, #tpu.memory_space<vmem>>, %arg5: memref<96x288xf32, #tpu.memory_space<vmem>>, %arg6: memref<1x288xf32, #tpu.memory_space<vmem>>, %arg7: memref<32x288xf32, #tpu.memory_space<vmem>>) attributes {dimension_semantics = [#tpu.dimension_semantics<parallel>, #tpu.dimension_semantics<parallel>], iteration_bounds = array<i64: 1, 1>, scalar_prefetch = 0 : i64, scratch_operands = 0 : i64, tpu.core_type = #tpu.core_type<tc>, window_params = [{transform_indices = @transform_0, window_bounds = array<i64: 32, 96>}, {pipeline_mode = #tpu.pipeline_mode<synchronous>, transform_indices = @transform_1, window_bounds = array<i64: 1, 96>}, {pipeline_mode = #tpu.pipeline_mode<synchronous>, transform_indices = @transform_2, window_bounds = array<i64: 1, 96>}, {transform_indices = @transform_3, window_bounds = array<i64: 96, 288>}, {transform_indices = @transform_4, window_bounds = array<i64: 1, 288>}, {transform_indices = @transform_5, window_bounds = array<i64: 32, 288>}]} {
    %c0 = arith.constant 0 : index
    %c0_0 = arith.constant 0 : index
    %0 = vector.load %arg2[%c0, %c0_0] : memref<32x96xf32, #tpu.memory_space<vmem>>, vector<32x96xf32>
    %cst = arith.constant dense<0.000000e+00> : vector<32xf32>
    %1 = vector.multi_reduction <add>, %0, %cst [1] : vector<32x96xf32> to vector<32xf32>
    %2 = vector.shape_cast %1 : vector<32xf32> to vector<32x1xf32>
    %cst_1 = arith.constant 9.600000e+01 : f32
    %3 = vector.broadcast %cst_1 : f32 to vector<32x1xf32>
    %4 = arith.divf %2, %3 : vector<32x1xf32>
    %5 = vector.broadcast %4 : vector<32x1xf32> to vector<32x96xf32>
    %6 = arith.subf %0, %5 : vector<32x96xf32>
    %7 = arith.mulf %6, %6 : vector<32x96xf32>
    %cst_2 = arith.constant dense<0.000000e+00> : vector<32xf32>
    %8 = vector.multi_reduction <add>, %7, %cst_2 [1] : vector<32x96xf32> to vector<32xf32>
    %9 = vector.shape_cast %8 : vector<32xf32> to vector<32x1xf32>
    %cst_3 = arith.constant 9.600000e+01 : f32
    %10 = vector.broadcast %cst_3 : f32 to vector<32x1xf32>
    %11 = arith.divf %9, %10 : vector<32x1xf32>
    %cst_4 = arith.constant 9.99999974E-6 : f32
    %12 = vector.broadcast %cst_4 : f32 to vector<32x1xf32>
    %13 = arith.addf %11, %12 : vector<32x1xf32>
    %14 = math.rsqrt %13 : vector<32x1xf32>
    %15 = vector.broadcast %14 : vector<32x1xf32> to vector<32x96xf32>
    %16 = arith.mulf %6, %15 : vector<32x96xf32>
    %c0_5 = arith.constant 0 : index
    %c0_6 = arith.constant 0 : index
    %17 = vector.load %arg3[%c0_5, %c0_6] : memref<1x96xf32, #tpu.memory_space<vmem>>, vector<1x96xf32>
    %18 = vector.broadcast %17 : vector<1x96xf32> to vector<32x96xf32>
    %19 = arith.mulf %16, %18 : vector<32x96xf32>
    %c0_7 = arith.constant 0 : index
    %c0_8 = arith.constant 0 : index
    %20 = vector.load %arg4[%c0_7, %c0_8] : memref<1x96xf32, #tpu.memory_space<vmem>>, vector<1x96xf32>
    %21 = vector.broadcast %20 : vector<1x96xf32> to vector<32x96xf32>
    %22 = arith.addf %19, %21 : vector<32x96xf32>
    %c0_9 = arith.constant 0 : index
    %c0_10 = arith.constant 0 : index
    %23 = vector.load %arg5[%c0_9, %c0_10] : memref<96x288xf32, #tpu.memory_space<vmem>>, vector<96x288xf32>
    %cst_11 = arith.constant dense<0.000000e+00> : vector<32x288xf32>
    %24 = tpu.matmul %22, %23, %cst_11 {dimension_numbers = #tpu.dot_dimension_numbers<[1], [0], [0], [1], [0, 0, 1, 1], [], []>} : vector<32x96xf32>, vector<96x288xf32>, vector<32x288xf32> -> vector<32x288xf32>
    %c0_12 = arith.constant 0 : index
    %c0_13 = arith.constant 0 : index
    %25 = vector.load %arg6[%c0_12, %c0_13] : memref<1x288xf32, #tpu.memory_space<vmem>>, vector<1x288xf32>
    %26 = vector.broadcast %25 : vector<1x288xf32> to vector<32x288xf32>
    %27 = arith.addf %24, %26 : vector<32x288xf32>
    %c0_14 = arith.constant 0 : index
    %c0_15 = arith.constant 0 : index
    %28 = vector.load %arg7[%c0_14, %c0_15] : memref<32x288xf32, #tpu.memory_space<vmem>>, vector<32x288xf32>
    tpu.vector_store %arg7[%c0_14, %c0_15], %27 {strides = array<i32>} : memref<32x288xf32, #tpu.memory_space<vmem>>, vector<32x288xf32>,
    return
  }
  func.func @transform_0(%arg0: i32, %arg1: i32) -> (i32, i32) {
    %c0_i32 = arith.constant 0 : i32
    %c0_i32_0 = arith.constant 0 : i32
    return %arg0, %c0_i32 : i32, i32
  }
  func.func @transform_1(%arg0: i32, %arg1: i32) -> (i32, i32) {
    %c0_i32 = arith.constant 0 : i32
    %c0_i32_0 = arith.constant 0 : i32
    %c0_i32_1 = arith.constant 0 : i32
    return %c0_i32, %c0_i32_0 : i32, i32
  }
  func.func @transform_2(%arg0: i32, %arg1: i32) -> (i32, i32) {
    %c0_i32 = arith.constant 0 : i32
    %c0_i32_0 = arith.constant 0 : i32
    %c0_i32_1 = arith.constant 0 : i32
    return %c0_i32, %c0_i32_0 : i32, i32
  }
  func.func @transform_3(%arg0: i32, %arg1: i32) -> (i32, i32) {
    %c0_i32 = arith.constant 0 : i32
    %c0_i32_0 = arith.constant 0 : i32
    return %c0_i32, %arg1 : i32, i32
  }
  func.func @transform_4(%arg0: i32, %arg1: i32) -> (i32, i32) {
    %c0_i32 = arith.constant 0 : i32
    %c0_i32_0 = arith.constant 0 : i32
    return %c0_i32, %arg1 : i32, i32
  }
  func.func @transform_5(%arg0: i32, %arg1: i32) -> (i32, i32) {
    %c0_i32 = arith.constant 0 : i32
    return %arg0, %arg1 : i32, i32
  }
}

</mosaic_0001>

<bundles_post_ra>
// kernel: transformer_decoder_forward.8
= control target key start
LH: loop header
LB: loop body
LE: loop exit
PB: predicated region body
PF: predicated region fallthrough
CT: control target
= control target key end

     0   :  { %10 = vsyncpa [#allocation3], 0  ;;  %s461_s18 = smov [#allocation2]   ;;  %s595_s0 = inlined_call_operand.vmem [shape: f32[32,96], index: 0, kind: input, shape index: {}]   ;;  %s596_s1 = inlined_call_operand.vmem [shape: f32[1,96], index: 1, kind: input, shape index: {}]   ;;  %s597_s2 = inlined_call_operand.vmem [shape: f32[1,96], index: 2, kind: input, shape index: {}]   ;;  %s598_s3 = inlined_call_operand.hbm [shape: f32[96,288], index: 3, kind: input, shape index: {}]   ;;  %s599_s4 = inlined_call_operand.vmem [shape: f32[1,288], index: 4, kind: input, shape index: {}]   ;;  %s600_s5 = inlined_call_operand.vmem [shape: f32[32,288], index: 5, kind: output, shape index: {}]  }
   0x1   :  { %s22_s19 = sshll.u32 %s461_s18, 4  ;;  %s23_s19 = int_to_ptr.vmem [resolvable:$true] %s22_s19 }
   0x2   :  { %s447_s20 = scalar_lea.vmem %s23_s19, 4608  ;;  %p452_p1 = scmp.lt.s32.totalorder %s23_s19, %s23_s19 }
   0x3   :  { %p448_p0 = scmp.ne.s32.totalorder %s23_s19, %s447_s20  ;;  %p453_p2 = scmp.lt.s32.totalorder %s447_s20, %s447_s20 }
   0x5   :  { %p454_p3 = por %p453_p2, %p452_p1 }
   0x7   :  { %p455_p4 = pnand %p454_p3, %p448_p0 }
   0x9   :  { %458 = shalt.err (!%p455_p4)
}
   0xa   :  { %s462_s21 = smov 384   ;;  %s463_s22 = smov 24  }
   0xb   :  { %28 = dma.hbm_to_vmem [thread:$0]  %s598_s3, 4608, %s23_s19, [#allocation3], %s462_s21, %s462_s21, %s463_s22  }
   0xc   :  { %459 = dma.done.wait [#allocation3], 4608  }
   0xd   :  { %460 = vsyncadd [#allocation3], 4294962688  ;;  %vm38_vm0 = vcmask 785408   ;;  %v34_v0 = vld [vmem:[%s595_s0] sm:$0xff]  ;;  %v36_v1 = vld [vmem:[%s595_s0 + $0x10] sm:$0xff]  ;;  %v464_v62 = vmov 0.0  }
   0xe   :  { %v35_v2 = vld [vmem:[%s595_s0 + $0x8] sm:$0xff]  ;;  %v39_v3 = vsel %vm38_vm0, %v34_v0, 0.0  ;;  %v45_v4 = vsel %vm38_vm0, %v36_v1, 0.0  ;;  %v37_v5 = vld [vmem:[%s595_s0 + $0x18] sm:$0xff]  ;;  %v148_v28 = vld [vmem:[#allocation2 + $0x110] sm:$0xff]  ;;  %243 = vmatprep.mubr.f32.mxu0 %v464_v62  ;;  %vm355_vm1 = vcmask 261120  }
   0xf   :  { %40 = vadd.xlane.f32.xlu0 %v39_v3  ;;  %46 = vadd.xlane.f32.xlu1 %v45_v4  ;;  %v42_v6 = vsel %vm38_vm0, %v35_v2, 0.0  ;;  %v48_v7 = vsel %vm38_vm0, %v37_v5, 0.0  ;;  %v147_v29 = vld [vmem:[#allocation2 + $0x108] sm:$0xff]  ;;  %v145_v30 = vld [vmem:[#allocation2 + $0xf8] sm:$0xff]  ;;  %v144_v31 = vld [vmem:[#allocation2 + $0xf0] sm:$0xff] }
  0x10   :  { %187 = vmatprep.subr.mxu0 %v148_v28  ;;  %v142_v32 = vld [vmem:[#allocation2 + $0xe0] sm:$0xff]  ;;  %v149_v33 = vld [vmem:[#allocation2 + $0x118] sm:$0xff]  ;;  %v139_v35 = vld [vmem:[#allocation2 + $0xc8] sm:$0xff] }
  0x11   :  { %188 = vmatpush1.msra.mxu0 %v147_v29  ;;  %397 = vmatprep.subr.mxu1 %v149_v33  ;;  %v141_v34 = vld [vmem:[#allocation2 + $0xd8] sm:$0xff]  ;;  %v146_v36 = vld [vmem:[#allocation2 + $0x100] sm:$0xff]  ;;  %v136_v38 = vld [vmem:[#allocation2 + $0xb0] sm:$0xff] }
  0x12   :  { %189 = vmatprep.subr.mxu0 %v145_v30  ;;  %398 = vmatpush3.msra.mxu1 %v149_v33  ;;  %v138_v37 = vld [vmem:[#allocation2 + $0xc0] sm:$0xff]  ;;  %v143_v39 = vld [vmem:[#allocation2 + $0xe8] sm:$0xff]  ;;  %v133_v41 = vld [vmem:[#allocation2 + $0x98] sm:$0xff] }
  0x13   :  { %43 = vadd.xlane.f32.xlu0 %v42_v6  ;;  %49 = vadd.xlane.f32.xlu1 %v48_v7  ;;  %v135_v40 = vld [vmem:[#allocation2 + $0xa8] sm:$0xff]  ;;  %v140_v42 = vld [vmem:[#allocation2 + $0xd0] sm:$0xff]  ;;  %v130_v44 = vld [vmem:[#allocation2 + $0x80] sm:$0xff] }
  0x14   :  { %190 = vmatpush1.msra.mxu0 %v144_v31  ;;  %399 = vmatprep.subr.mxu1 %v146_v36  ;;  %v132_v43 = vld [vmem:[#allocation2 + $0x90] sm:$0xff]  ;;  %v137_v45 = vld [vmem:[#allocation2 + $0xb8] sm:$0xff]  ;;  %v127_v47 = vld [vmem:[#allocation2 + $0x68] sm:$0xff] }
  0x15   :  { %191 = vmatprep.subr.mxu0 %v142_v32  ;;  %400 = vmatpush3.msra.mxu1 %v146_v36  ;;  %v129_v46 = vld [vmem:[#allocation2 + $0x78] sm:$0xff]  ;;  %v134_v48 = vld [vmem:[#allocation2 + $0xa0] sm:$0xff]  ;;  %v124_v50 = vld [vmem:[#allocation2 + $0x50] sm:$0xff] }
  0x16   :  { %192 = vmatpush1.msra.mxu0 %v141_v34  ;;  %401 = vmatprep.subr.mxu1 %v143_v39  ;;  %v126_v49 = vld [vmem:[#allocation2 + $0x60] sm:$0xff]  ;;  %v131_v51 = vld [vmem:[#allocation2 + $0x88] sm:$0xff]  ;;  %v121_v53 = vld [vmem:[#allocation2 + $0x38] sm:$0xff] }
  0x17   :  { %193 = vmatprep.subr.mxu0 %v139_v35  ;;  %402 = vmatpush3.msra.mxu1 %v143_v39  ;;  %v123_v52 = vld [vmem:[#allocation2 + $0x48] sm:$0xff]  ;;  %v128_v54 = vld [vmem:[#allocation2 + $0x70] sm:$0xff]  ;;  %v118_v56 = vld [vmem:[#allocation2 + $0x20] sm:$0xff] }
  0x18   :  { %194 = vmatpush1.msra.mxu0 %v138_v37  ;;  %403 = vmatprep.subr.mxu1 %v140_v42  ;;  %v120_v55 = vld [vmem:[#allocation2 + $0x30] sm:$0xff]  ;;  %v125_v57 = vld [vmem:[#allocation2 + $0x58] sm:$0xff]  ;;  %v115_v59 = vld [vmem:[#allocation2 + $0x8] sm:$0xff] }
  0x19   :  { %195 = vmatprep.subr.mxu0 %v136_v38  ;;  %404 = vmatpush3.msra.mxu1 %v140_v42  ;;  %v117_v58 = vld [vmem:[#allocation2 + $0x18] sm:$0xff]  ;;  %v122_v60 = vld [vmem:[#allocation2 + $0x40] sm:$0xff]  ;;  %v119_v63 = vld [vmem:[#allocation2 + $0x28] sm:$0xff] }
  0x1a   :  { %196 = vmatpush1.msra.mxu0 %v135_v40  ;;  %405 = vmatprep.subr.mxu1 %v137_v45  ;;  %v114_v61 = vld [vmem:[#allocation2] sm:$0xff] }
  0x1b   :  { %197 = vmatprep.subr.mxu0 %v133_v41  ;;  %406 = vmatpush3.msra.mxu1 %v137_v45  ;;  %v150_v34 = vld [vmem:[%s599_s4] sm:$0x7] }
  0x1c   :  { %198 = vmatpush1.msra.mxu0 %v132_v43  ;;  %407 = vmatprep.subr.mxu1 %v134_v48 }
  0x1d   :  { %199 = vmatprep.subr.mxu0 %v130_v44  ;;  %408 = vmatpush3.msra.mxu1 %v134_v48 }
  0x1e   :  { %200 = vmatpush1.msra.mxu0 %v129_v46  ;;  %409 = vmatprep.subr.mxu1 %v131_v51 }
  0x1f   :  { %201 = vmatprep.subr.mxu0 %v127_v47  ;;  %410 = vmatpush3.msra.mxu1 %v131_v51 }
  0x20   :  { %202 = vmatpush1.msra.mxu0 %v126_v49  ;;  %411 = vmatprep.subr.mxu1 %v128_v54 }
  0x21   :  { %203 = vmatprep.subr.mxu0 %v124_v50  ;;  %412 = vmatpush3.msra.mxu1 %v128_v54 }
  0x22   :  { %204 = vmatpush1.msra.mxu0 %v123_v52  ;;  %413 = vmatprep.subr.mxu1 %v125_v57 }
  0x23   :  { %205 = vmatprep.subr.mxu0 %v121_v53  ;;  %414 = vmatpush3.msra.mxu1 %v125_v57 }
  0x24   :  { %206 = vmatpush1.msra.mxu0 %v120_v55  ;;  %415 = vmatprep.subr.mxu1 %v122_v60 }
  0x25   :  { %207 = vmatprep.subr.mxu0 %v118_v56  ;;  %416 = vmatpush3.msra.mxu1 %v122_v60 }
  0x26   :  { %208 = vmatpush1.msra.mxu0 %v117_v58  ;;  %417 = vmatprep.subr.mxu1 %v119_v63 }
  0x27   :  { %209 = vmatprep.subr.mxu0 %v115_v59  ;;  %418 = vmatpush3.msra.mxu1 %v119_v63 }
  0x28   :  { %210 = vmatpush1.msra.mxu0 %v114_v61 }
  0x98   :  { %v41_v8 = vpop.xlane.xlu0 %40  ;;  %v47_v9 = vpop.xlane.xlu1 %46 }
  0x99   :  { %v52_v10 = vmul.f32 0.010416667, %v41_v8  ;;  %v54_v11 = vmul.f32 0.010416667, %v47_v9 }
  0x9b   :  { %v514_v12 = vsub.f32 %v34_v0, %v52_v10  ;;  %v516_v13 = vsub.f32 %v36_v1, %v54_v11  ;;  %v116_v0 = vld [vmem:[#allocation2 + $0x10] sm:$0xff] }
  0x9c   :  { %v44_v14 = vpop.xlane.xlu0 %43  ;;  %v50_v15 = vpop.xlane.xlu1 %49  ;;  %419 = vmatprep.subr.mxu1 %v116_v0 }
  0x9d   :  { %v53_v16 = vmul.f32 0.010416667, %v44_v14  ;;  %v55_v17 = vmul.f32 0.010416667, %v50_v15  ;;  %v60_v18 = vmul.f32 %v514_v12, %v514_v12  ;;  %v62_v19 = vmul.f32 %v516_v13, %v516_v13  ;;  %420 = vmatpush3.msra.mxu1 %v116_v0 }
  0x9f   :  { %v522_v20 = vsub.f32 %v35_v2, %v53_v16  ;;  %v524_v21 = vsub.f32 %v37_v5, %v55_v17  ;;  %v64_v22 = vsel %vm38_vm0, %v60_v18, 0.0  ;;  %v70_v23 = vsel %vm38_vm0, %v62_v19, 0.0  ;;  %v371_v16 = vld [vmem:[%s596_s1] ss:$0 sm:$0xff] }
  0xa0   :  { %65 = vadd.xlane.f32.xlu0 %v64_v22  ;;  %v372_v18 = vld [vmem:[%s597_s2] ss:$0 sm:$0xff] }
  0xa1   :  { %v61_v24 = vmul.f32 %v522_v20, %v522_v20  ;;  %v63_v25 = vmul.f32 %v524_v21, %v524_v21 }
  0xa3   :  { %v67_v26 = vsel %vm38_vm0, %v61_v24, 0.0  ;;  %v73_v27 = vsel %vm38_vm0, %v63_v25, 0.0 }
  0xa4   :  { %71 = vadd.xlane.f32.xlu0 %v70_v23  ;;  %68 = vadd.xlane.f32.xlu1 %v67_v26 }
  0xa8   :  { %74 = vadd.xlane.f32.xlu1 %v73_v27 }
 0x129   :  { %v66_v1 = vpop.xlane.xlu0 %65 }
 0x12a   :  { %v76_v2 = vmul.f32 0.010416667, %v66_v1 }
 0x12c   :  { %v80_v3 = vadd.f32 1e-05, %v76_v2 }
 0x12d   :  { %v69_v4 = vpop.xlane.xlu1 %68  ;;  %v72_v5 = vpop.xlane.xlu0 %71 }
 0x12e   :  { %431 = vrsqrt.f32 %v80_v3  ;;  %v77_v6 = vmul.f32 0.010416667, %v69_v4  ;;  %v78_v7 = vmul.f32 0.010416667, %v72_v5 }
 0x130   :  { %v81_v8 = vadd.f32 1e-05, %v77_v6  ;;  %v82_v9 = vadd.f32 1e-05, %v78_v7 }
 0x131   :  { %v75_v10 = vpop.xlane.xlu1 %74 }
 0x132   :  { %433 = vrsqrt.f32 %v81_v8  ;;  %v79_v11 = vmul.f32 0.010416667, %v75_v10 }
 0x133   :  { %435 = vrsqrt.f32 %v82_v9 }
 0x134   :  { %v83_v14 = vadd.f32 1e-05, %v79_v11 }
 0x136   :  { %437 = vrsqrt.f32 %v83_v14 }
 0x13b   :  { %v432_v15 = vpop.eup %431 }
 0x13c   :  { %v88_v17 = vmul.f32 %v432_v15, %v514_v12 }
 0x13e   :  { %v99_v19 = vmul.f32 %v371_v16, %v88_v17 }
 0x13f   :  { %v434_v22 = vpop.eup %433 }
 0x140   :  { %v436_v23 = vpop.eup %435  ;;  %v110_v24 = vadd.f32 %v372_v18, %v99_v19  ;;  %v89_v25 = vmul.f32 %v434_v22, %v522_v20  ;;  %v152_v20 = vlaneseq }
 0x141   :  { %v90_v26 = vmul.f32 %v436_v23, %v516_v13 }
 0x142   :  { %373 = vmatmul.mubr.msk.f32.vlgmr.msra.gmra.mxu0 %vm38_vm0, %v110_v24  ;;  %421 = vmatprep.mubr.msk.f32.mxu1 %vm38_vm0, %v110_v24  ;;  %v100_v27 = vmul.f32 %v371_v16, %v89_v25  ;;  %v153_v33 = vshrl.u32 %v152_v20, 7 }
 0x143   :  { %v438_v28 = vpop.eup %437  ;;  %249 = vmatprep.mubr.f32.mxu0 %v464_v62  ;;  %v101_v12 = vmul.f32 %v371_v16, %v90_v26 }
 0x144   :  { %v111_v29 = vadd.f32 %v372_v18, %v100_v27  ;;  %v91_v30 = vmul.f32 %v438_v28, %v524_v21  ;;  %v154_v21 = vsub.s32 0, %v153_v33  ;;  %v158_v35 = vsub.s32 1, %v153_v33 }
 0x145   :  { %v112_v31 = vadd.f32 %v372_v18, %v101_v12  ;;  %v162_v37 = vsub.s32 2, %v153_v33 }
 0x146   :  { %374 = vmatmul.mubr.msk.f32.gmra.mxu0 %vm38_vm0, %v111_v29  ;;  %422 = vmatmul.mubr.msk.f32.vlgmr.msra.gmra.mxu1 %vm38_vm0, %v111_v29  ;;  %v102_v32 = vmul.f32 %v371_v16, %v91_v30  ;;  %v155_v36 = vrot.slane %v150_v34, %v154_v21  ;;  %v159_v38 = vrot.slane %v150_v34, %v158_v35 }
 0x147   :  { %424 = vmatprep.mubr.msk.f32.mxu1 %vm38_vm0, %v112_v31  ;;  %255 = vmatprep.mubr.f32.mxu0 %v464_v62  ;;  %v163_v41 = vrot.slane %v150_v34, %v162_v37 }
 0x148   :  { %v113_v13 = vadd.f32 %v372_v18, %v102_v32 }
 0x14a   :  { %375 = vmatmul.mubr.msk.f32.gmra.mxu0 %vm38_vm0, %v112_v31  ;;  %425 = vmatmul.mubr.msk.f32.gmra.mxu1 %vm38_vm0, %v113_v13 }
 0x14b   :  { %261 = vmatprep.mubr.f32.mxu0 %v464_v62 }
 0x14e   :  { %376 = vmatmul.mubr.msk.f32.gmra.mxu0 %vm38_vm0, %v113_v13 }
 0x202   :  { %v245_v39 = vpop.f32.mrf.mxu0 }
 0x203   :  { %v246_v40 = vadd.f32 %v245_v39, %v155_v36 }
 0x204   :  { %v247_v42 = vpop.f32.mrf.mxu0 }
 0x205   :  { %353 = vst [vmem:[%s600_s5] sm:$0xff] %v246_v40  ;;  %v248_v43 = vadd.f32 %v247_v42, %v159_v38 }
 0x206   :  { %v251_v44 = vpop.f32.mrf.mxu0  ;;  %v423_v45 = vpop.f32.mrf.mxu1 }
 0x207   :  { %354 = vst [vmem:[%s600_s5 + $0x8] sm:$0xff] %v248_v43  ;;  %v252_v46 = vadd.f32 %v251_v44, %v155_v36  ;;  %v340_v47 = vadd.f32 %v423_v45, %v163_v41 }
 0x208   :  { %v253_v48 = vpop.f32.mrf.mxu0  ;;  %v334_v49 = vpop.f32.mrf.mxu1 }
 0x209   :  { %357 = vst [vmem:[%s600_s5 + $0x18] sm:$0xff] %v252_v46  ;;  %359 = vst.msk [vmem:[%s600_s5 + $0x28] sm:$0xff] %vm355_vm1, %v340_v47  ;;  %v254_v50 = vadd.f32 %v253_v48, %v159_v38  ;;  %v335_v51 = vadd.f32 %v334_v49, %v163_v41 }
 0x20a   :  { %v257_v52 = vpop.f32.mrf.mxu0  ;;  %v426_v53 = vpop.f32.mrf.mxu1 }
 0x20b   :  { %358 = vst [vmem:[%s600_s5 + $0x20] sm:$0xff] %v254_v50  ;;  %356 = vst.msk [vmem:[%s600_s5 + $0x10] sm:$0xff] %vm355_vm1, %v335_v51  ;;  %v258_v54 = vadd.f32 %v257_v52, %v155_v36  ;;  %v350_v55 = vadd.f32 %v426_v53, %v163_v41 }
 0x20c   :  { %v259_v56 = vpop.f32.mrf.mxu0  ;;  %v344_v57 = vpop.f32.mrf.mxu1 }
 0x20d   :  { %360 = vst [vmem:[%s600_s5 + $0x30] sm:$0xff] %v258_v54  ;;  %365 = vst.msk [vmem:[%s600_s5 + $0x58] sm:$0xff] %vm355_vm1, %v350_v55  ;;  %v260_v58 = vadd.f32 %v259_v56, %v159_v38  ;;  %v345_v59 = vadd.f32 %v344_v57, %v163_v41 }
 0x20e   :  { %v263_v60 = vpop.f32.mrf.mxu0 }
 0x20f   :  { %361 = vst [vmem:[%s600_s5 + $0x38] sm:$0xff] %v260_v58  ;;  %362 = vst.msk [vmem:[%s600_s5 + $0x40] sm:$0xff] %vm355_vm1, %v345_v59  ;;  %v264_v61 = vadd.f32 %v263_v60, %v155_v36 }
 0x210   :  { %v265_v62 = vpop.f32.mrf.mxu0 }
 0x211   :  { %363 = vst [vmem:[%s600_s5 + $0x48] sm:$0xff] %v264_v61  ;;  %v266_v63 = vadd.f32 %v265_v62, %v159_v38 }
 0x213   :  { %364 = vst [vmem:[%s600_s5 + $0x50] sm:$0xff] %v266_v63 }
 0x214   :  { %370 = vsyncpa [#allocation3], 1 }

// kernel: transformer_decoder_forward.9
= control target key start
LH: loop header
LB: loop body
LE: loop exit
PB: predicated region body
PF: predicated region fallthrough
CT: control target
= control target key end

     0   :  { %s1231_s15 = smov 0   ;;  %s1374_s0 = inlined_call_operand.vmem [shape: f32[2,16,288], index: 0, kind: input, shape index: {}]   ;;  %s1375_s1 = inlined_call_operand.vmem [shape: f32[96,96], index: 1, kind: input, shape index: {}]   ;;  %s1376_s2 = inlined_call_operand.vmem [shape: f32[1,96], index: 2, kind: input, shape index: {}]   ;;  %s1377_s3 = inlined_call_operand.vmem [shape: f32[2,16,96], index: 3, kind: input, shape index: {}]   ;;  %s1378_s4 = inlined_call_operand.vmem [shape: f32[2,16,96], index: 4, kind: output, shape index: {}]  }
   0x1 LB: > { %s1017_s16 = sadd.s32 4294967295, %s1201_s15   ;;  %p1021_p0 = scmp.ge.s32.totalorder %s1201_s15, 1  ;;  %s1201_s15 = sphi %s1231_s15, %s14_s15  }
   0x2   : > { %p172_p1 = scmp.lt.s32.totalorder %s1201_s15, 3 }
   0x4   : > { %p173_p2 = pnand %p1021_p0, %p172_p1 }
   0x5   : > { %p203_p3 = scmp.lt.s32.totalorder (!%p173_p2), %s1017_s16, 1  ;;  %s1203_s21 = smov (!%p173_p2), 32  }
   0x6   : > { %176 = sbr.rel (%p173_p2) target bundleno = 1692 (0x69c), region = 36  ;;  %s1204_s22 = smov (!%p173_p2), 96  }
   0x7   : > { %s1205_s23 = smov (!%p173_p2), 64  }
   0xb   : > { %s1380_s16 = smov (!%p203_p3, %s1017_s16), 1  ;;  %vm230_vm0 = vcmask 261120   ;;  %vm316_vm1 = vcmask 130048   ;;  %vm840_vm2 = vcmask 523264   ;;  %vm862_vm3 = vcmask 785408  }
   0xc   : > { %s1159_s17 = smul.u32 48, %s1380_s16  ;;  %s1050_s25 = sshll.u32 %s1380_s16, 4 }
   0xd   : > { %s217_s6 = scalar_lea.vmem %s1378_s4, %s1050_s25 }
   0xe   : > { %s1245_s20 = scalar_lea.vmem %s1374_s0, %s1159_s17 }
   0xf   : > { %v221_v0 = vld [vmem:[%s1245_s20 + $0x18] sm:$0xff]  ;;  %v218_v1 = vld [vmem:[%s1245_s20] sm:$0xff]  ;;  %v1264_v6 = vld [vmem:[%s1245_s20 + $0x8] sm:$0xff] }
  0x10   : > { %228 = vrot.lane.b32.xlu0 %v221_v0, %s1203_s21  ;;  %428 = vrot.lane.b32.xlu1 %v218_v1, %s1204_s22  ;;  %v1257_v4 = vld [vmem:[%s1245_s20 + $0x20] sm:$0xff] }
  0x11   : > { %1094 = vmatprep.mubr.msk.f32.mxu0 %vm230_vm0, %v218_v1 }
  0x14   : > { %226 = vrot.lane.b32.xlu0 %v218_v1, %s1203_s21  ;;  %430 = vrot.lane.b32.xlu1 %v221_v0, %s1204_s22 }
  0x82   : > { %v229_v2 = vpop.permute.xlu0 %228  ;;  %v429_v5 = vpop.permute.xlu1 %428 }
  0x83   : > { %1090 = vmatprep.subr.msk.mxu0 %vm230_vm0, %v229_v2 }
  0x84   : > { %1091 = vmatpush3.xpose.msk.msra.mxu0 %vm230_vm0, %v229_v2 }
  0x86   : > { %v227_v3 = vpop.permute.xlu0 %226  ;;  %v431_v7 = vpop.permute.xlu1 %430 }
  0x87   : > { %1092 = vmatprep.subr.msk.mxu0 %vm230_vm0, %v227_v3 }
  0x88   : > { %1093 = vmatpush3.xpose.msk.msra.mxu0 %vm230_vm0, %v227_v3 }
  0x89   : > { %1104 = vmatprep.subr.msk.mxu0 %vm230_vm0, %v1257_v4 }
  0x8b   : > { %1095 = vmatmul.mubr.msk.f32.vlgmr.msra.gmra.mxu0 %vm230_vm0, %v221_v0 }
  0x8c   : > { %1105 = vmatpush3.xpose.msk.msra.mxu0 %vm230_vm0, %v1257_v4  ;;  %1108 = vmatprep.mubr.msk.f32.mxu0 %vm230_vm0, %v429_v5 }
  0x8d   : > { %1106 = vmatprep.subr.msk.mxu0 %vm230_vm0, %v1264_v6 }
  0x90   : > { %1107 = vmatpush3.xpose.msk.msra.mxu0 %vm230_vm0, %v1264_v6 }
  0x93   : > { %1109 = vmatmul.mubr.msk.f32.vlgmr.msra.gmra.mxu0 %vm230_vm0, %v431_v7 }
 0x14b   : > { %v1096_v8 = vpop.f32.mrf.mxu0 }
 0x14c   : > { %v315_v16 = vmul.f32 0.17677669, %v1096_v8 }
 0x14d   : > { %v305_v9 = vpop.f32.mrf.mxu0 }
 0x14e   : > { %v320_v17 = vsel %vm316_vm1, %v315_v16, -inf  ;;  %v314_v29 = vmul.f32 0.17677669, %v305_v9 }
 0x150   : > { %v317_v30 = vsel %vm316_vm1, %v314_v29, -inf }
 0x153   : > { %v1110_v10 = vpop.f32.mrf.mxu0 }
 0x154   : > { %v516_v11 = vmul.f32 0.17677669, %v1110_v10 }
 0x155   : > { %v506_v12 = vpop.f32.mrf.mxu0 }
 0x156   : > { %v515_v13 = vmul.f32 0.17677669, %v506_v12  ;;  %v520_v14 = vsel %vm316_vm1, %v516_v11, -inf }
 0x157   : > { %521 = vmax.xlane.f32.xlu1 %v520_v14 }
 0x158   : > { %v517_v15 = vsel %vm316_vm1, %v515_v13, -inf }
 0x159   : > { %518 = vmax.xlane.f32.xlu0 %v517_v15 }
 0x168   : > { %541 = vrot.lane.b32.xlu1 %v1257_v4, %s1203_s21 }
 0x16c   : > { %632 = vrot.lane.b32.xlu1 %v1257_v4, %s1204_s22 }
 0x170   : > { %630 = vrot.lane.b32.xlu1 %v1264_v6, %s1204_s22 }
 0x174   : > { %628 = vrot.lane.b32.xlu1 %v221_v0, %s1205_s23 }
 0x198   : > { %321 = vmax.xlane.f32.xlu1 %v320_v17 }
 0x1e0   : > { %v522_v18 = vpop.xlane.xlu1 %521 }
 0x1e1   : > { %v524_v19 = vsub.f32 %v516_v11, %v522_v18  ;;  %v220_v18 = vld [vmem:[%s1245_s20 + $0x10] sm:$0xff] }
 0x1e2   : > { %v519_v20 = vpop.xlane.xlu0 %518 }
 0x1e3   : > { %v527_v21 = vmul.f32 1.442695, %v524_v19  ;;  %v523_v22 = vsub.f32 %v515_v13, %v519_v20 }
 0x1e4   : > { %v542_v23 = vpop.permute.xlu1 %541 }
 0x1e5   : > { %1171 = vpow2.f32 %v527_v21  ;;  %v525_v24 = vmul.f32 1.442695, %v523_v22  ;;  %1111 = vmatprep.subr.mxu0 %v542_v23  ;;  %v854_v22 = vld [vmem:[%s1375_s1 + $0x58] sm:$0xff] }
 0x1e6   : > { %1112 = vmatpush3.msra.mxu0 %v542_v23  ;;  %v853_v23 = vld [vmem:[%s1375_s1 + $0x50] sm:$0xff] }
 0x1e7   : > { %1173 = vpow2.f32 %v525_v24  ;;  %v852_v24 = vld [vmem:[%s1375_s1 + $0x48] sm:$0xff] }
 0x1e8   : > { %v633_v34 = vpop.permute.xlu1 %632 }
 0x1ec   : > { %v631_v40 = vpop.permute.xlu1 %630 }
 0x1f0   : > { %v629_v41 = vpop.permute.xlu1 %628 }
 0x1f2   : > { %v1172_v25 = vpop.eup %1171 }
 0x1f3   : > { %v532_v26 = vsel %vm316_vm1, %v1172_v25, 0.0 }
 0x1f4   : > { %v1174_v27 = vpop.eup %1173  ;;  %533 = vadd.xlane.f32.xlu0 %v532_v26  ;;  %v850_v26 = vld [vmem:[%s1375_s1 + $0x38] sm:$0xff] }
 0x1f5   : > { %v529_v28 = vsel %vm316_vm1, %v1174_v27, 0.0 }
 0x1f8   : > { %530 = vadd.xlane.f32.xlu0 %v529_v28  ;;  %v848_v28 = vld [vmem:[%s1375_s1 + $0x28] sm:$0xff] }
 0x20e   : > { %539 = vrot.lane.b32.xlu0 %v1264_v6, %s1203_s21 }
 0x212   : > { %626 = vrot.lane.b32.xlu0 %v218_v1, %s1205_s23 }
 0x221   : > { %v322_v47 = vpop.xlane.xlu1 %321 }
 0x222   : > { %v324_v48 = vsub.f32 %v315_v16, %v322_v47 }
 0x224   : > { %v327_v49 = vmul.f32 1.442695, %v324_v48 }
 0x231   : > { %318 = vmax.xlane.f32.xlu0 %v317_v30  ;;  %v846_v30 = vld [vmem:[%s1375_s1 + $0x18] sm:$0xff] }
 0x27d   : > { %v534_v31 = vpop.xlane.xlu0 %533 }
 0x27e   : > { %1175 = vrcp.f32 %v534_v31  ;;  %v845_v31 = vld [vmem:[%s1375_s1 + $0x10] sm:$0xff] }
 0x281   : > { %v531_v32 = vpop.xlane.xlu0 %530 }
 0x282   : > { %1177 = vrcp.f32 %v531_v32  ;;  %v844_v32 = vld [vmem:[%s1375_s1 + $0x8] sm:$0xff] }
 0x285   : > { %v540_v33 = vpop.permute.xlu0 %539 }
 0x286   : > { %1113 = vmatprep.subr.mxu0 %v540_v33 }
 0x287   : > { %1114 = vmatpush3.msra.mxu0 %v540_v33  ;;  %v843_v33 = vld [vmem:[%s1375_s1] sm:$0xff] }
 0x288   : > { %1118 = vmatprep.subr.msk.mxu0 %vm230_vm0, %v633_v34 }
 0x289   : > { %v627_v39 = vpop.permute.xlu0 %626 }
 0x28b   : > { %v1176_v35 = vpop.eup %1175 }
 0x28c   : > { %v538_v38 = vmul.f32 %v1176_v35, %v1172_v25  ;;  %v851_v25 = vld [vmem:[%s1375_s1 + $0x40] sm:$0xff] }
 0x28f   : > { %v1178_v36 = vpop.eup %1177 }
 0x290   : > { %v536_v37 = vmul.f32 %v1178_v36, %v1174_v27  ;;  %v849_v27 = vld [vmem:[%s1375_s1 + $0x30] sm:$0xff] }
 0x292   : > { %1115 = vmatprep.mubr.msk.f32.mxu0 %vm316_vm1, %v536_v37 }
 0x293   : > { %1116 = vmatmul.mubr.msk.f32.vlgmr.msra.gmra.mxu0 %vm316_vm1, %v538_v38 }
 0x294   : > { %1119 = vmatpush3.xpose.msk.msra.mxu0 %vm230_vm0, %v633_v34  ;;  %1122 = vmatprep.mubr.msk.f32.mxu0 %vm230_vm0, %v627_v39 }
 0x295   : > { %1120 = vmatprep.subr.msk.mxu0 %vm230_vm0, %v631_v40 }
 0x298   : > { %1121 = vmatpush3.xpose.msk.msra.mxu0 %vm230_vm0, %v631_v40 }
 0x29b   : > { %1123 = vmatmul.mubr.msk.f32.vlgmr.msra.gmra.mxu0 %vm230_vm0, %v629_v41 }
 0x2ba   : > { %v319_v42 = vpop.xlane.xlu0 %318 }
 0x2bb   : > { %v323_v43 = vsub.f32 %v314_v29, %v319_v42  ;;  %v847_v29 = vld [vmem:[%s1375_s1 + $0x20] sm:$0xff] }
 0x2bd   : > { %v325_v44 = vmul.f32 1.442695, %v323_v43 }
 0x2bf   : > { %1179 = vpow2.f32 %v325_v44 }
 0x2c0   : > { %1181 = vpow2.f32 %v327_v49 }
 0x2cc   : > { %v1180_v45 = vpop.eup %1179 }
 0x2cd   : > { %v329_v46 = vsel %vm316_vm1, %v1180_v45, 0.0  ;;  %v1182_v58 = vpop.eup %1181 }
 0x2ce   : > { %330 = vadd.xlane.f32.xlu1 %v329_v46  ;;  %v332_v62 = vsel %vm316_vm1, %v1182_v58, 0.0  ;;  %v1045_v46 = vld [vmem:[%s1376_s2] ss:$0 sm:$0xff] }
 0x353   : > { %v1117_v50 = vpop.f32.mrf.mxu0 }
 0x355   : > { %v617_v52 = vpop.f32.mrf.mxu0 }
 0x357   : > { %v331_v51 = vpop.xlane.xlu1 %330 }
 0x358   : > { %1183 = vrcp.f32 %v331_v51 }
 0x35b   : > { %v1124_v53 = vpop.f32.mrf.mxu0 }
 0x35c   : > { %v718_v56 = vmul.f32 0.17677669, %v1124_v53 }
 0x35d   : > { %v708_v54 = vpop.f32.mrf.mxu0 }
 0x35e   : > { %v717_v55 = vmul.f32 0.17677669, %v708_v54  ;;  %v722_v59 = vsel %vm316_vm1, %v718_v56, -inf }
 0x360   : > { %v719_v57 = vsel %vm316_vm1, %v717_v55, -inf }
 0x361   : > { %720 = vmax.xlane.f32.xlu0 %v719_v57 }
 0x365   : > { %v1184_v60 = vpop.eup %1183  ;;  %723 = vmax.xlane.f32.xlu0 %v722_v59 }
 0x366   : > { %v336_v61 = vmul.f32 %v1184_v60, %v1180_v45 }
 0x368   : > { %1101 = vmatprep.mubr.msk.f32.mxu1 %vm316_vm1, %v336_v61 }
 0x369   : > { %333 = vadd.xlane.f32.xlu0 %v332_v62 }
 0x3ea   : > { %v721_v63 = vpop.xlane.xlu0 %720 }
 0x3eb   : > { %v725_v0 = vsub.f32 %v717_v55, %v721_v63 }
 0x3ed   : > { %v727_v1 = vmul.f32 1.442695, %v725_v0 }
 0x3ee   : > { %v724_v2 = vpop.xlane.xlu0 %723 }
 0x3ef   : > { %1185 = vpow2.f32 %v727_v1  ;;  %v726_v3 = vsub.f32 %v718_v56, %v724_v2 }
 0x3f1   : > { %v729_v5 = vmul.f32 1.442695, %v726_v3 }
 0x3f2   : > { %v334_v11 = vpop.xlane.xlu0 %333 }
 0x3f3   : > { %1187 = vpow2.f32 %v729_v5 }
 0x3f4   : > { %1189 = vrcp.f32 %v334_v11 }
 0x3fc   : > { %v1186_v7 = vpop.eup %1185 }
 0x3fd   : > { %v731_v8 = vsel %vm316_vm1, %v1186_v7, 0.0 }
 0x3fe   : > { %732 = vadd.xlane.f32.xlu1 %v731_v8 }
 0x400   : > { %v1188_v9 = vpop.eup %1187 }
 0x401   : > { %v734_v10 = vsel %vm316_vm1, %v1188_v9, 0.0  ;;  %v1190_v15 = vpop.eup %1189 }
 0x402   : > { %735 = vadd.xlane.f32.xlu0 %v734_v10  ;;  %v338_v17 = vmul.f32 %v1190_v15, %v1182_v58 }
 0x40f   : > { %343 = vrot.lane.b32.xlu1 %v1257_v4, %s1205_s23  ;;  %v223_v4 = vld [vmem:[%s1245_s20 + $0x28] sm:$0xff] }
 0x413   : > { %824 = vrot.lane.b32.xlu1 %v617_v52, %s1203_s21 }
 0x417   : > { %826 = vrot.lane.b32.xlu1 %v1117_v50, %s1203_s21 }
 0x418   : > { %341 = vrot.lane.b32.xlu0 %v1264_v6, %s1205_s23 }
 0x487   : > { %v733_v12 = vpop.xlane.xlu1 %732 }
 0x488   : > { %1191 = vrcp.f32 %v733_v12 }
 0x48b   : > { %v344_v13 = vpop.permute.xlu1 %343  ;;  %v736_v14 = vpop.xlane.xlu0 %735 }
 0x48c   : > { %1193 = vrcp.f32 %v736_v14  ;;  %1097 = vmatprep.subr.mxu1 %v344_v13 }
 0x48d   : > { %1098 = vmatpush3.msra.mxu1 %v344_v13 }
 0x48f   : > { %v342_v16 = vpop.permute.xlu0 %341  ;;  %v825_v38 = vpop.permute.xlu1 %824 }
 0x490   : > { %1099 = vmatprep.subr.mxu1 %v342_v16 }
 0x491   : > { %1100 = vmatpush3.msra.mxu1 %v342_v16 }
 0x492   : > { %1102 = vmatmul.mubr.msk.f32.vlgmr.msra.gmra.mxu1 %vm316_vm1, %v338_v17  ;;  %1125 = vmatprep.subr.mxu1 %v223_v4 }
 0x493   : > { %1126 = vmatpush3.msra.mxu1 %v223_v4  ;;  %v827_v39 = vpop.permute.xlu1 %826 }
 0x494   : > { %1127 = vmatprep.subr.mxu1 %v220_v18 }
 0x495   : > { %v1192_v6 = vpop.eup %1191  ;;  %1128 = vmatpush3.msra.mxu1 %v220_v18 }
 0x496   : > { %v738_v19 = vmul.f32 %v1192_v6, %v1186_v7  ;;  %1132 = vmatprep.subr.mxu1 %v854_v22 }
 0x498   : > { %1129 = vmatprep.mubr.msk.f32.mxu1 %vm316_vm1, %v738_v19 }
 0x499   : > { %v1194_v20 = vpop.eup %1193 }
 0x49a   : > { %v740_v21 = vmul.f32 %v1194_v20, %v1188_v9 }
 0x49c   : > { %1130 = vmatmul.mubr.msk.f32.vlgmr.msra.gmra.mxu1 %vm316_vm1, %v740_v21 }
 0x49d   : > { %1133 = vmatpush3.msra.mxu1 %v854_v22 }
 0x49e   : > { %1134 = vmatprep.subr.mxu1 %v853_v23 }
 0x49f   : > { %1135 = vmatpush3.msra.mxu1 %v853_v23 }
 0x4a0   : > { %1136 = vmatprep.subr.mxu1 %v852_v24 }
 0x4a1   : > { %1137 = vmatpush3.msra.mxu1 %v852_v24 }
 0x4a2   : > { %1138 = vmatprep.subr.mxu1 %v851_v25 }
 0x4a3   : > { %1139 = vmatpush3.msra.mxu1 %v851_v25 }
 0x4a4   : > { %1140 = vmatprep.subr.mxu1 %v850_v26 }
 0x4a5   : > { %1141 = vmatpush3.msra.mxu1 %v850_v26 }
 0x4a6   : > { %1142 = vmatprep.subr.mxu1 %v849_v27 }
 0x4a7   : > { %1143 = vmatpush3.msra.mxu1 %v849_v27 }
 0x4a8   : > { %1144 = vmatprep.subr.mxu1 %v848_v28 }
 0x4a9   : > { %1145 = vmatpush3.msra.mxu1 %v848_v28 }
 0x4aa   : > { %1146 = vmatprep.subr.mxu1 %v847_v29 }
 0x4ab   : > { %1147 = vmatpush3.msra.mxu1 %v847_v29 }
 0x4ac   : > { %1148 = vmatprep.subr.mxu1 %v846_v30 }
 0x4ad   : > { %1149 = vmatpush3.msra.mxu1 %v846_v30 }
 0x4ae   : > { %1150 = vmatprep.subr.mxu1 %v845_v31 }
 0x4af   : > { %1151 = vmatpush3.msra.mxu1 %v845_v31 }
 0x4b0   : > { %1152 = vmatprep.subr.mxu1 %v844_v32 }
 0x4b1   : > { %1153 = vmatpush3.msra.mxu1 %v844_v32 }
 0x4b2   : > { %1154 = vmatprep.subr.mxu1 %v843_v33 }
 0x4b3   : > { %1155 = vmatpush3.msra.mxu1 %v843_v33 }
 0x552   : > { %v1103_v34 = vpop.f32.mrf.mxu1 }
 0x553   : > { %v839_v43 = vsel %vm230_vm0, %v1103_v34, %v827_v39 }
 0x554   : > { %v419_v35 = vpop.f32.mrf.mxu1 }
 0x555   : > { %v838_v41 = vsel %vm230_vm0, %v419_v35, %v825_v38 }
 0x55c   : > { %v1131_v36 = vpop.f32.mrf.mxu1 }
 0x55d   : > { %834 = vrot.lane.b32.xlu1 %v1131_v36, %s1205_s23 }
 0x55e   : > { %v813_v37 = vpop.f32.mrf.mxu1 }
 0x55f   : > { %832 = vrot.lane.b32.xlu0 %v813_v37, %s1205_s23  ;;  %s212_s23 = scalar_lea.vmem %s1377_s3, %s1050_s25 }
 0x560   : > { %v945_v48 = vld [vmem:[%s212_s23 + $0x8] sm:$0xff]  ;;  %v944_v51 = vld [vmem:[%s212_s23] sm:$0xff] }
 0x5cf   : > { %v835_v40 = vpop.permute.xlu1 %834 }
 0x5d0   : > { %v842_v45 = vsel %vm840_vm2, %v839_v43, %v835_v40 }
 0x5d1   : > { %v833_v42 = vpop.permute.xlu0 %832 }
 0x5d2   : > { %v841_v44 = vsel %vm840_vm2, %v838_v41, %v833_v42 }
 0x5d3   : > { %1156 = vmatprep.mubr.msk.f32.mxu1 %vm862_vm3, %v841_v44 }
 0x5d4   : > { %1157 = vmatmul.mubr.msk.f32.vlgmr.msra.gmra.mxu1 %vm862_vm3, %v842_v45 }
 0x694   : > { %v1158_v47 = vpop.f32.mrf.mxu1 }
 0x695   : > { %v941_v49 = vadd.f32 %v1158_v47, %v1045_v46 }
 0x696   : > { %v935_v50 = vpop.f32.mrf.mxu1 }
 0x697   : > { %v947_v52 = vadd.f32 %v945_v48, %v941_v49  ;;  %v936_v53 = vadd.f32 %v1045_v46, %v935_v50 }
 0x699   : > { %949 = vst.msk [vmem:[%s217_s6 + $0x8] sm:$0xff] %vm862_vm3, %v947_v52  ;;  %v946_v54 = vadd.f32 %v944_v51, %v936_v53 }
 0x69b   : > { %948 = vst.msk [vmem:[%s217_s6] sm:$0xff] %vm862_vm3, %v946_v54 }
 0x69c PF: > { %s14_s15 = sadd.s32 1, %s1201_s15  }
 0x69d   : > { %p11_p4 = scmp.ge.s32.totalorder %s14_s15, 4  }
 0x69f   :  { %13 = sbr.rel (!%p11_p4) target bundleno = 1 (0x1), region = 69 }

// kernel: transformer_decoder_forward.10
= control target key start
LH: loop header
LB: loop body
LE: loop exit
PB: predicated region body
PF: predicated region fallthrough
CT: control target
= control target key end

     0   :  { %vm24_vm0 = vcmask 785408   ;;  %vm252_vm1 = vcmask 392192   ;;  %s489_s0 = inlined_call_operand.vmem [shape: f32[32,96], index: 0, kind: input, shape index: {}]   ;;  %s490_s3 = inlined_call_operand.vmem [shape: f32[96,48], index: 3, kind: input, shape index: {}]   ;;  %s491_s1 = inlined_call_operand.vmem [shape: f32[1,96], index: 1, kind: input, shape index: {}]   ;;  %s492_s2 = inlined_call_operand.vmem [shape: f32[1,96], index: 2, kind: input, shape index: {}]   ;;  %s493_s4 = inlined_call_operand.vmem [shape: f32[1,48], index: 4, kind: input, shape index: {}]   ;;  %s494_s5 = inlined_call_operand.vmem [shape: f32[32,48], index: 5, kind: output, shape index: {}]  }
   0x1   :  { %v20_v0 = vld [vmem:[%s489_s0] sm:$0xff]  ;;  %v21_v1 = vld [vmem:[%s489_s0 + $0x8] sm:$0xff]  ;;  %v22_v2 = vld [vmem:[%s489_s0 + $0x10] sm:$0xff] }
   0x2   :  { %v25_v3 = vsel %vm24_vm0, %v20_v0, 0.0  ;;  %v28_v4 = vsel %vm24_vm0, %v21_v1, 0.0  ;;  %v23_v5 = vld [vmem:[%s489_s0 + $0x18] sm:$0xff]  ;;  %v31_v6 = vsel %vm24_vm0, %v22_v2, 0.0  ;;  %v110_v29 = vld [vmem:[%s490_s3 + $0x50] sm:$0xff]  ;;  %v109_v30 = vld [vmem:[%s490_s3 + $0x48] sm:$0xff] }
   0x3   :  { %26 = vadd.xlane.f32.xlu0 %v25_v3  ;;  %29 = vadd.xlane.f32.xlu1 %v28_v4  ;;  %v34_v7 = vsel %vm24_vm0, %v23_v5, 0.0  ;;  %v111_v28 = vld [vmem:[%s490_s3 + $0x58] sm:$0xff]  ;;  %v108_v31 = vld [vmem:[%s490_s3 + $0x40] sm:$0xff]  ;;  %v106_v33 = vld [vmem:[%s490_s3 + $0x30] sm:$0xff] }
   0x4   :  { %284 = vmatprep.subr.mxu0 %v111_v28  ;;  %314 = vmatprep.subr.mxu1 %v111_v28  ;;  %v107_v32 = vld [vmem:[%s490_s3 + $0x38] sm:$0xff]  ;;  %v105_v34 = vld [vmem:[%s490_s3 + $0x28] sm:$0xff]  ;;  %v104_v35 = vld [vmem:[%s490_s3 + $0x20] sm:$0xff] }
   0x5   :  { %285 = vmatpush3.msra.mxu0 %v111_v28  ;;  %326 = vmatpush3.msra.mxu1 %v111_v28  ;;  %v103_v36 = vld [vmem:[%s490_s3 + $0x18] sm:$0xff]  ;;  %v102_v37 = vld [vmem:[%s490_s3 + $0x10] sm:$0xff]  ;;  %v101_v38 = vld [vmem:[%s490_s3 + $0x8] sm:$0xff] }
   0x6   :  { %286 = vmatprep.subr.mxu0 %v110_v29  ;;  %315 = vmatprep.subr.mxu1 %v110_v29  ;;  %v100_v39 = vld [vmem:[%s490_s3] sm:$0xff] }
   0x7   :  { %32 = vadd.xlane.f32.xlu0 %v31_v6  ;;  %35 = vadd.xlane.f32.xlu1 %v34_v7  ;;  %v261_v53 = vld [vmem:[%s491_s1] ss:$0 sm:$0xff] }
   0x8   :  { %287 = vmatpush3.msra.mxu0 %v110_v29  ;;  %327 = vmatpush3.msra.mxu1 %v110_v29  ;;  %v262_v55 = vld [vmem:[%s492_s2] ss:$0 sm:$0xff] }
   0x9   :  { %288 = vmatprep.subr.mxu0 %v109_v30  ;;  %316 = vmatprep.subr.mxu1 %v109_v30  ;;  %v263_v6 = vld [vmem:[%s493_s4] ss:$0 sm:$0xff] }
   0xa   :  { %289 = vmatpush3.msra.mxu0 %v109_v30  ;;  %328 = vmatpush3.msra.mxu1 %v109_v30 }
   0xb   :  { %290 = vmatprep.subr.mxu0 %v108_v31  ;;  %317 = vmatprep.subr.mxu1 %v108_v31 }
   0xc   :  { %291 = vmatpush3.msra.mxu0 %v108_v31  ;;  %329 = vmatpush3.msra.mxu1 %v108_v31 }
   0xd   :  { %292 = vmatprep.subr.mxu0 %v107_v32  ;;  %318 = vmatprep.subr.mxu1 %v107_v32 }
   0xe   :  { %293 = vmatpush3.msra.mxu0 %v107_v32  ;;  %330 = vmatpush3.msra.mxu1 %v107_v32 }
   0xf   :  { %294 = vmatprep.subr.mxu0 %v106_v33  ;;  %319 = vmatprep.subr.mxu1 %v106_v33 }
  0x10   :  { %295 = vmatpush3.msra.mxu0 %v106_v33  ;;  %331 = vmatpush3.msra.mxu1 %v106_v33 }
  0x11   :  { %296 = vmatprep.subr.mxu0 %v105_v34  ;;  %320 = vmatprep.subr.mxu1 %v105_v34 }
  0x12   :  { %297 = vmatpush3.msra.mxu0 %v105_v34  ;;  %332 = vmatpush3.msra.mxu1 %v105_v34 }
  0x13   :  { %298 = vmatprep.subr.mxu0 %v104_v35  ;;  %321 = vmatprep.subr.mxu1 %v104_v35 }
  0x14   :  { %299 = vmatpush3.msra.mxu0 %v104_v35  ;;  %333 = vmatpush3.msra.mxu1 %v104_v35 }
  0x15   :  { %300 = vmatprep.subr.mxu0 %v103_v36  ;;  %322 = vmatprep.subr.mxu1 %v103_v36 }
  0x16   :  { %301 = vmatpush3.msra.mxu0 %v103_v36  ;;  %334 = vmatpush3.msra.mxu1 %v103_v36 }
  0x17   :  { %302 = vmatprep.subr.mxu0 %v102_v37  ;;  %323 = vmatprep.subr.mxu1 %v102_v37 }
  0x18   :  { %303 = vmatpush3.msra.mxu0 %v102_v37  ;;  %335 = vmatpush3.msra.mxu1 %v102_v37 }
  0x19   :  { %304 = vmatprep.subr.mxu0 %v101_v38  ;;  %324 = vmatprep.subr.mxu1 %v101_v38 }
  0x1a   :  { %305 = vmatpush3.msra.mxu0 %v101_v38  ;;  %336 = vmatpush3.msra.mxu1 %v101_v38 }
  0x1b   :  { %306 = vmatprep.subr.mxu0 %v100_v39  ;;  %325 = vmatprep.subr.mxu1 %v100_v39 }
  0x1c   :  { %307 = vmatpush3.msra.mxu0 %v100_v39  ;;  %337 = vmatpush3.msra.mxu1 %v100_v39 }
  0x8c   :  { %v27_v8 = vpop.xlane.xlu0 %26  ;;  %v30_v9 = vpop.xlane.xlu1 %29 }
  0x8d   :  { %v38_v10 = vmul.f32 0.010416667, %v27_v8  ;;  %v39_v11 = vmul.f32 0.010416667, %v30_v9 }
  0x8f   :  { %v400_v12 = vsub.f32 %v20_v0, %v38_v10  ;;  %v402_v13 = vsub.f32 %v21_v1, %v39_v11 }
  0x90   :  { %v33_v14 = vpop.xlane.xlu0 %32  ;;  %v36_v15 = vpop.xlane.xlu1 %35 }
  0x91   :  { %v40_v16 = vmul.f32 0.010416667, %v33_v14  ;;  %v41_v17 = vmul.f32 0.010416667, %v36_v15  ;;  %v46_v18 = vmul.f32 %v400_v12, %v400_v12  ;;  %v47_v19 = vmul.f32 %v402_v13, %v402_v13 }
  0x93   :  { %v408_v20 = vsub.f32 %v22_v2, %v40_v16  ;;  %v410_v21 = vsub.f32 %v23_v5, %v41_v17  ;;  %v50_v22 = vsel %vm24_vm0, %v46_v18, 0.0  ;;  %v53_v23 = vsel %vm24_vm0, %v47_v19, 0.0 }
  0x94   :  { %51 = vadd.xlane.f32.xlu0 %v50_v22 }
  0x95   :  { %v48_v24 = vmul.f32 %v408_v20, %v408_v20  ;;  %v49_v25 = vmul.f32 %v410_v21, %v410_v21 }
  0x97   :  { %v56_v26 = vsel %vm24_vm0, %v48_v24, 0.0  ;;  %v59_v27 = vsel %vm24_vm0, %v49_v25, 0.0 }
  0x98   :  { %54 = vadd.xlane.f32.xlu0 %v53_v23  ;;  %57 = vadd.xlane.f32.xlu1 %v56_v26 }
  0x9c   :  { %60 = vadd.xlane.f32.xlu1 %v59_v27 }
 0x11d   :  { %v52_v40 = vpop.xlane.xlu0 %51 }
 0x11e   :  { %v62_v41 = vmul.f32 0.010416667, %v52_v40 }
 0x120   :  { %v66_v42 = vadd.f32 1e-05, %v62_v41 }
 0x121   :  { %v58_v43 = vpop.xlane.xlu1 %57  ;;  %v55_v44 = vpop.xlane.xlu0 %54 }
 0x122   :  { %338 = vrsqrt.f32 %v66_v42  ;;  %v64_v45 = vmul.f32 0.010416667, %v58_v43  ;;  %v63_v46 = vmul.f32 0.010416667, %v55_v44 }
 0x124   :  { %v68_v47 = vadd.f32 1e-05, %v64_v45  ;;  %v67_v48 = vadd.f32 1e-05, %v63_v46 }
 0x125   :  { %v61_v49 = vpop.xlane.xlu1 %60 }
 0x126   :  { %340 = vrsqrt.f32 %v68_v47  ;;  %v65_v50 = vmul.f32 0.010416667, %v61_v49 }
 0x127   :  { %342 = vrsqrt.f32 %v67_v48 }
 0x128   :  { %v69_v51 = vadd.f32 1e-05, %v65_v50 }
 0x12a   :  { %344 = vrsqrt.f32 %v69_v51 }
 0x12f   :  { %v339_v52 = vpop.eup %338 }
 0x130   :  { %v74_v54 = vmul.f32 %v339_v52, %v400_v12 }
 0x132   :  { %v85_v56 = vmul.f32 %v261_v53, %v74_v54 }
 0x133   :  { %v341_v57 = vpop.eup %340 }
 0x134   :  { %v343_v58 = vpop.eup %342  ;;  %v96_v59 = vadd.f32 %v262_v55, %v85_v56  ;;  %v76_v60 = vmul.f32 %v341_v57, %v408_v20 }
 0x135   :  { %v75_v61 = vmul.f32 %v343_v58, %v402_v13 }
 0x136   :  { %308 = vmatprep.mubr.msk.f32.mxu0 %vm24_vm0, %v96_v59  ;;  %v87_v62 = vmul.f32 %v261_v53, %v76_v60 }
 0x137   :  { %v345_v63 = vpop.eup %344  ;;  %v86_v0 = vmul.f32 %v261_v53, %v75_v61 }
 0x138   :  { %v98_v1 = vadd.f32 %v262_v55, %v87_v62  ;;  %v77_v2 = vmul.f32 %v345_v63, %v410_v21 }
 0x139   :  { %v97_v3 = vadd.f32 %v262_v55, %v86_v0 }
 0x13a   :  { %311 = vmatprep.mubr.msk.f32.mxu1 %vm24_vm0, %v98_v1  ;;  %v88_v4 = vmul.f32 %v261_v53, %v77_v2 }
 0x13b   :  { %309 = vmatmul.mubr.msk.f32.vlgmr.msra.gmra.mxu0 %vm24_vm0, %v97_v3 }
 0x13c   :  { %v99_v5 = vadd.f32 %v262_v55, %v88_v4 }
 0x13e   :  { %312 = vmatmul.mubr.msk.f32.vlgmr.msra.gmra.mxu1 %vm24_vm0, %v99_v5 }
 0x1fb   :  { %v310_v7 = vpop.f32.mrf.mxu0 }
 0x1fc   :  { %v203_v8 = vadd.f32 %v310_v7, %v263_v6 }
 0x1fd   :  { %v197_v9 = vpop.f32.mrf.mxu0 }
 0x1fe   :  { %v221_v10 = vmul.f32 0.044715, %v203_v8  ;;  %v198_v11 = vadd.f32 %v263_v6, %v197_v9  ;;  %v313_v12 = vpop.f32.mrf.mxu1  ;;  %v217_v36 = vmul.f32 0.5, %v203_v8 }
 0x1ff   :  { %v213_v13 = vadd.f32 %v313_v12, %v263_v6 }
 0x200   :  { %v225_v14 = vmul.f32 %v221_v10, %v203_v8  ;;  %v220_v15 = vmul.f32 0.044715, %v198_v11  ;;  %v207_v16 = vpop.f32.mrf.mxu1  ;;  %v216_v41 = vmul.f32 0.5, %v198_v11 }
 0x201   :  { %v223_v17 = vmul.f32 0.044715, %v213_v13  ;;  %v208_v18 = vadd.f32 %v263_v6, %v207_v16  ;;  %v219_v43 = vmul.f32 0.5, %v213_v13 }
 0x202   :  { %v229_v19 = vmul.f32 %v225_v14, %v203_v8  ;;  %v224_v20 = vmul.f32 %v220_v15, %v198_v11 }
 0x203   :  { %v227_v21 = vmul.f32 %v223_v17, %v213_v13  ;;  %v222_v22 = vmul.f32 0.044715, %v208_v18  ;;  %v218_v48 = vmul.f32 0.5, %v208_v18 }
 0x204   :  { %v233_v23 = vadd.f32 %v229_v19, %v203_v8  ;;  %v228_v24 = vmul.f32 %v224_v20, %v198_v11 }
 0x205   :  { %v231_v25 = vmul.f32 %v227_v21, %v213_v13  ;;  %v226_v26 = vmul.f32 %v222_v22, %v208_v18 }
 0x206   :  { %v237_v27 = vmul.f32 0.7978846, %v233_v23  ;;  %v232_v28 = vadd.f32 %v228_v24, %v198_v11 }
 0x207   :  { %v235_v29 = vadd.f32 %v231_v25, %v213_v13  ;;  %v230_v30 = vmul.f32 %v226_v26, %v208_v18 }
 0x208   :  { %346 = vtanh.f32 %v237_v27  ;;  %v236_v31 = vmul.f32 0.7978846, %v232_v28 }
 0x209   :  { %v239_v32 = vmul.f32 0.7978846, %v235_v29  ;;  %v234_v33 = vadd.f32 %v230_v30, %v208_v18 }
 0x20a   :  { %348 = vtanh.f32 %v236_v31 }
 0x20b   :  { %350 = vtanh.f32 %v239_v32  ;;  %v238_v34 = vmul.f32 0.7978846, %v234_v33 }
 0x20d   :  { %352 = vtanh.f32 %v238_v34 }
 0x215   :  { %v347_v35 = vpop.eup %346 }
 0x216   :  { %v245_v37 = vadd.f32 1.0, %v347_v35 }
 0x217   :  { %v349_v38 = vpop.eup %348 }
 0x218   :  { %v351_v39 = vpop.eup %350  ;;  %v249_v40 = vmul.f32 %v245_v37, %v217_v36  ;;  %v244_v42 = vadd.f32 1.0, %v349_v38 }
 0x219   :  { %v247_v44 = vadd.f32 1.0, %v351_v39 }
 0x21a   :  { %v353_v45 = vpop.eup %352  ;;  %254 = vst.msk [vmem:[%s494_s5 + $0x8] sm:$0xff] %vm252_vm1, %v249_v40  ;;  %v248_v46 = vmul.f32 %v244_v42, %v216_v41 }
 0x21b   :  { %v251_v47 = vmul.f32 %v247_v44, %v219_v43  ;;  %v246_v49 = vadd.f32 1.0, %v353_v45 }
 0x21c   :  { %253 = vst.msk [vmem:[%s494_s5] sm:$0xff] %vm252_vm1, %v248_v46 }
 0x21d   :  { %256 = vst.msk [vmem:[%s494_s5 + $0x18] sm:$0xff] %vm252_vm1, %v251_v47  ;;  %v250_v50 = vmul.f32 %v246_v49, %v218_v48 }
 0x21f   :  { %255 = vst.msk [vmem:[%s494_s5 + $0x10] sm:$0xff] %vm252_vm1, %v250_v50 }

// kernel: transformer_decoder_forward.11
= control target key start
LH: loop header
LB: loop body
LE: loop exit
PB: predicated region body
PF: predicated region fallthrough
CT: control target
= control target key end

     0   :  { %vm21_vm0 = vcmask 785408   ;;  %v227_v2 = vmov 0.0   ;;  %vm40_vm1 = vcmask 392192   ;;  %s322_s1 = inlined_call_operand.vmem [shape: f32[48,96], index: 1, kind: input, shape index: {}]   ;;  %s323_s0 = inlined_call_operand.vmem [shape: f32[32,48], index: 0, kind: input, shape index: {}]   ;;  %s324_s2 = inlined_call_operand.vmem [shape: f32[1,96], index: 2, kind: input, shape index: {}]   ;;  %s325_s3 = inlined_call_operand.vmem [shape: f32[32,96], index: 3, kind: input, shape index: {}]   ;;  %s326_s4 = inlined_call_operand.vmem [shape: f32[32,96], index: 4, kind: output, shape index: {}]  }
   0x1   :  { %v39_v0 = vld [vmem:[%s322_s1 + $0x28] sm:$0xff]  ;;  %v38_v1 = vld [vmem:[%s322_s1 + $0x20] sm:$0xff]  ;;  %23 = vst.msk [vmem:[#allocation2 + $0x8] sm:$0xff] %vm21_vm0, %v227_v2  ;;  %22 = vst.msk [vmem:[#allocation2] sm:$0xff] %vm21_vm0, %v227_v2 }
   0x2   :  { %24 = vst.msk [vmem:[#allocation2 + $0x10] sm:$0xff] %vm21_vm0, %v227_v2  ;;  %25 = vst.msk [vmem:[#allocation2 + $0x18] sm:$0xff] %vm21_vm0, %v227_v2  ;;  %196 = vmatprep.subr.mxu0 %v39_v0  ;;  %214 = vmatprep.subr.mxu1 %v39_v0  ;;  %v37_v3 = vld [vmem:[%s322_s1 + $0x18] sm:$0xff]  ;;  %v36_v4 = vld [vmem:[%s322_s1 + $0x10] sm:$0xff] }
   0x3   :  { %197 = vmatpush3.msra.mxu0 %v39_v0  ;;  %220 = vmatpush3.msra.mxu1 %v39_v0  ;;  %v35_v5 = vld [vmem:[%s322_s1 + $0x8] sm:$0xff]  ;;  %v34_v6 = vld [vmem:[%s322_s1] sm:$0xff]  ;;  %v32_v8 = vld [vmem:[%s323_s0 + $0x10] sm:$0xff] }
   0x4   :  { %198 = vmatprep.subr.mxu0 %v38_v1  ;;  %215 = vmatprep.subr.mxu1 %v38_v1  ;;  %v30_v7 = vld [vmem:[%s323_s0] sm:$0xff]  ;;  %v31_v9 = vld [vmem:[%s323_s0 + $0x8] sm:$0xff]  ;;  %v33_v10 = vld [vmem:[%s323_s0 + $0x18] sm:$0xff] }
   0x5   :  { %199 = vmatpush3.msra.mxu0 %v38_v1  ;;  %221 = vmatpush3.msra.mxu1 %v38_v1  ;;  %v185_v23 = vld [vmem:[%s324_s2] ss:$0 sm:$0xff]  ;;  %v166_v24 = vld [vmem:[%s325_s3 + $0x8] sm:$0xff]  ;;  %v168_v27 = vld [vmem:[%s325_s3 + $0x18] sm:$0xff] }
   0x6   :  { %200 = vmatprep.subr.mxu0 %v37_v3  ;;  %216 = vmatprep.subr.mxu1 %v37_v3  ;;  %v165_v30 = vld [vmem:[%s325_s3] sm:$0xff]  ;;  %v167_v33 = vld [vmem:[%s325_s3 + $0x10] sm:$0xff] }
   0x7   :  { %201 = vmatpush3.msra.mxu0 %v37_v3  ;;  %222 = vmatpush3.msra.mxu1 %v37_v3 }
   0x8   :  { %202 = vmatprep.subr.mxu0 %v36_v4  ;;  %217 = vmatprep.subr.mxu1 %v36_v4  ;;  %v27_v11 = vld [vmem:[#allocation2 + $0x8] sm:$0xff]  ;;  %v26_v15 = vld [vmem:[#allocation2] sm:$0xff] }
   0x9   :  { %203 = vmatpush3.msra.mxu0 %v36_v4  ;;  %223 = vmatpush3.msra.mxu1 %v36_v4  ;;  %v29_v12 = vld [vmem:[#allocation2 + $0x18] sm:$0xff]  ;;  %v28_v16 = vld [vmem:[#allocation2 + $0x10] sm:$0xff] }
   0xa   :  { %204 = vmatprep.subr.mxu0 %v35_v5  ;;  %218 = vmatprep.subr.mxu1 %v35_v5 }
   0xb   :  { %205 = vmatpush3.msra.mxu0 %v35_v5  ;;  %224 = vmatpush3.msra.mxu1 %v35_v5 }
   0xc   :  { %206 = vmatprep.subr.mxu0 %v34_v6  ;;  %219 = vmatprep.subr.mxu1 %v34_v6 }
   0xd   :  { %207 = vmatpush3.msra.mxu0 %v34_v6  ;;  %225 = vmatpush3.msra.mxu1 %v34_v6 }
   0xe   :  { %208 = vmatprep.mubr.msk.f32.mxu0 %vm40_vm1, %v30_v7  ;;  %211 = vmatprep.mubr.msk.f32.mxu1 %vm40_vm1, %v32_v8 }
   0xf   :  { %209 = vmatmul.mubr.msk.f32.vlgmr.msra.gmra.mxu0 %vm40_vm1, %v31_v9  ;;  %212 = vmatmul.mubr.msk.f32.vlgmr.msra.gmra.mxu1 %vm40_vm1, %v33_v10 }
  0xcf   :  { %v210_v13 = vpop.f32.mrf.mxu0  ;;  %v213_v14 = vpop.f32.mrf.mxu1 }
  0xd0   :  { %v139_v17 = vadd.f32 %v210_v13, %v27_v11  ;;  %v141_v18 = vadd.f32 %v213_v14, %v29_v12 }
  0xd1   :  { %v119_v19 = vpop.f32.mrf.mxu0  ;;  %v129_v20 = vpop.f32.mrf.mxu1 }
  0xd2   :  { %144 = vst.msk [vmem:[#allocation2 + $0x8] sm:$0xff] %vm21_vm0, %v139_v17  ;;  %146 = vst.msk [vmem:[#allocation2 + $0x18] sm:$0xff] %vm21_vm0, %v141_v18  ;;  %v138_v21 = vadd.f32 %v119_v19, %v26_v15  ;;  %v140_v22 = vadd.f32 %v129_v20, %v28_v16 }
  0xd4   :  { %143 = vst.msk [vmem:[#allocation2] sm:$0xff] %vm21_vm0, %v138_v21  ;;  %145 = vst.msk [vmem:[#allocation2 + $0x10] sm:$0xff] %vm21_vm0, %v140_v22 }
  0xd9   :  { %v151_v25 = vld [vmem:[#allocation2 + $0x8] sm:$0xff]  ;;  %v153_v26 = vld [vmem:[#allocation2 + $0x18] sm:$0xff] }
  0xda   :  { %v162_v28 = vadd.f32 %v185_v23, %v151_v25  ;;  %v164_v29 = vadd.f32 %v185_v23, %v153_v26 }
  0xdb   :  { %v150_v31 = vld [vmem:[#allocation2] sm:$0xff]  ;;  %v152_v32 = vld [vmem:[#allocation2 + $0x10] sm:$0xff] }
  0xdc   :  { %v170_v34 = vadd.f32 %v166_v24, %v162_v28  ;;  %v172_v35 = vadd.f32 %v168_v27, %v164_v29  ;;  %v161_v36 = vadd.f32 %v185_v23, %v150_v31  ;;  %v163_v37 = vadd.f32 %v185_v23, %v152_v32 }
  0xde   :  { %174 = vst.msk [vmem:[%s326_s4 + $0x8] sm:$0xff] %vm21_vm0, %v170_v34  ;;  %176 = vst.msk [vmem:[%s326_s4 + $0x18] sm:$0xff] %vm21_vm0, %v172_v35  ;;  %v169_v38 = vadd.f32 %v165_v30, %v161_v36  ;;  %v171_v39 = vadd.f32 %v167_v33, %v163_v37 }
  0xe0   :  { %173 = vst.msk [vmem:[%s326_s4] sm:$0xff] %vm21_vm0, %v169_v38  ;;  %175 = vst.msk [vmem:[%s326_s4 + $0x10] sm:$0xff] %vm21_vm0, %v171_v39 }

// kernel: transformer_decoder_forward.15
= control target key start
LH: loop header
LB: loop body
LE: loop exit
PB: predicated region body
PF: predicated region fallthrough
CT: control target
= control target key end

     0   :  { %vm22_vm0 = vcmask 785408   ;;  %v265_v2 = vmov 0.0   ;;  %s354_s0 = inlined_call_operand.vmem [shape: f32[32,48], index: 0, kind: input, shape index: {}]   ;;  %s355_s1 = inlined_call_operand.vmem [shape: f32[48,96], index: 1, kind: input, shape index: {}]   ;;  %s356_s2 = inlined_call_operand.vmem [shape: f32[1,96], index: 2, kind: input, shape index: {}]   ;;  %s357_s3 = inlined_call_operand.vmem [shape: f32[32,96], index: 3, kind: input, shape index: {}]   ;;  %s358_s4 = inlined_call_operand.hbm [shape: f32[32,96], index: 4, kind: output, shape index: {}]  }
   0x1   :  { %v40_v0 = vld [vmem:[%s355_s1 + $0x28] sm:$0xff]  ;;  %v39_v1 = vld [vmem:[%s355_s1 + $0x20] sm:$0xff]  ;;  %24 = vst.msk [vmem:[#allocation2 + $0x8] sm:$0xff] %vm22_vm0, %v265_v2  ;;  %23 = vst.msk [vmem:[#allocation2] sm:$0xff] %vm22_vm0, %v265_v2 }
   0x2   :  { %209 = vmatprep.subr.mxu0 %v40_v0  ;;  %227 = vmatprep.subr.mxu1 %v40_v0  ;;  %25 = vst.msk [vmem:[#allocation2 + $0x10] sm:$0xff] %vm22_vm0, %v265_v2  ;;  %26 = vst.msk [vmem:[#allocation2 + $0x18] sm:$0xff] %vm22_vm0, %v265_v2  ;;  %v38_v3 = vld [vmem:[%s355_s1 + $0x18] sm:$0xff] }
   0x3   :  { %210 = vmatpush3.msra.mxu0 %v40_v0  ;;  %233 = vmatpush3.msra.mxu1 %v40_v0 }
   0x4   :  { %211 = vmatprep.subr.mxu0 %v39_v1  ;;  %228 = vmatprep.subr.mxu1 %v39_v1 }
   0x5   :  { %9 = vsyncpa [#allocation4], 0  ;;  %212 = vmatpush3.msra.mxu0 %v39_v1  ;;  %234 = vmatpush3.msra.mxu1 %v39_v1  ;;  %v37_v4 = vld [vmem:[%s355_s1 + $0x10] sm:$0xff]  ;;  %v36_v5 = vld [vmem:[%s355_s1 + $0x8] sm:$0xff]  ;;  %vm41_vm1 = vcmask 392192   ;;  %s266_s15 = smov [#allocation3]  }
   0x6   :  { %213 = vmatprep.subr.mxu0 %v38_v3  ;;  %229 = vmatprep.subr.mxu1 %v38_v3  ;;  %v35_v6 = vld [vmem:[%s355_s1] sm:$0xff]  ;;  %v33_v8 = vld [vmem:[%s354_s0 + $0x10] sm:$0xff]  ;;  %v32_v9 = vld [vmem:[%s354_s0 + $0x8] sm:$0xff]  ;;  %s183_s16 = sshll.u32 %s266_s15, 4  ;;  %s184_s16 = int_to_ptr.vmem [resolvable:$true] %s183_s16 }
   0x7   :  { %214 = vmatpush3.msra.mxu0 %v38_v3  ;;  %235 = vmatpush3.msra.mxu1 %v38_v3  ;;  %v31_v7 = vld [vmem:[%s354_s0] sm:$0xff]  ;;  %v34_v10 = vld [vmem:[%s354_s0 + $0x18] sm:$0xff]  ;;  %v167_v24 = vld [vmem:[%s357_s3 + $0x8] sm:$0xff]  ;;  %s243_s18 = scalar_lea.vmem %s184_s16, 512  ;;  %p248_p1 = scmp.lt.s32.totalorder %s184_s16, %s184_s16 }
   0x8   :  { %215 = vmatprep.subr.mxu0 %v37_v4  ;;  %230 = vmatprep.subr.mxu1 %v37_v4  ;;  %v28_v11 = vld [vmem:[#allocation2 + $0x8] sm:$0xff]  ;;  %v27_v15 = vld [vmem:[#allocation2] sm:$0xff]  ;;  %v169_v27 = vld [vmem:[%s357_s3 + $0x18] sm:$0xff]  ;;  %p244_p0 = scmp.ne.s32.totalorder %s184_s16, %s243_s18  ;;  %p249_p2 = scmp.lt.s32.totalorder %s243_s18, %s243_s18 }
   0x9   :  { %216 = vmatpush3.msra.mxu0 %v37_v4  ;;  %236 = vmatpush3.msra.mxu1 %v37_v4  ;;  %v30_v12 = vld [vmem:[#allocation2 + $0x18] sm:$0xff]  ;;  %v29_v16 = vld [vmem:[#allocation2 + $0x10] sm:$0xff]  ;;  %v198_v23 = vld [vmem:[%s356_s2] ss:$0 sm:$0xff] }
   0xa   :  { %217 = vmatprep.subr.mxu0 %v36_v5  ;;  %231 = vmatprep.subr.mxu1 %v36_v5  ;;  %v166_v30 = vld [vmem:[%s357_s3] sm:$0xff]  ;;  %v168_v33 = vld [vmem:[%s357_s3 + $0x10] sm:$0xff]  ;;  %p250_p3 = por %p249_p2, %p248_p1 }
   0xb   :  { %218 = vmatpush3.msra.mxu0 %v36_v5  ;;  %237 = vmatpush3.msra.mxu1 %v36_v5 }
   0xc   :  { %219 = vmatprep.subr.mxu0 %v35_v6  ;;  %232 = vmatprep.subr.mxu1 %v35_v6  ;;  %p251_p4 = pnand %p250_p3, %p244_p0 }
   0xd   :  { %220 = vmatpush3.msra.mxu0 %v35_v6  ;;  %238 = vmatpush3.msra.mxu1 %v35_v6 }
   0xe   :  { %221 = vmatprep.mubr.msk.f32.mxu0 %vm41_vm1, %v31_v7  ;;  %224 = vmatprep.mubr.msk.f32.mxu1 %vm41_vm1, %v33_v8 }
   0xf   :  { %222 = vmatmul.mubr.msk.f32.vlgmr.msra.gmra.mxu0 %vm41_vm1, %v32_v9  ;;  %225 = vmatmul.mubr.msk.f32.vlgmr.msra.gmra.mxu1 %vm41_vm1, %v34_v10 }
  0xcf   :  { %v223_v13 = vpop.f32.mrf.mxu0  ;;  %v226_v14 = vpop.f32.mrf.mxu1 }
  0xd0   :  { %v140_v17 = vadd.f32 %v223_v13, %v28_v11  ;;  %v142_v18 = vadd.f32 %v226_v14, %v30_v12 }
  0xd1   :  { %v120_v19 = vpop.f32.mrf.mxu0  ;;  %v130_v20 = vpop.f32.mrf.mxu1 }
  0xd2   :  { %145 = vst.msk [vmem:[#allocation2 + $0x8] sm:$0xff] %vm22_vm0, %v140_v17  ;;  %147 = vst.msk [vmem:[#allocation2 + $0x18] sm:$0xff] %vm22_vm0, %v142_v18  ;;  %v139_v21 = vadd.f32 %v120_v19, %v27_v15  ;;  %v141_v22 = vadd.f32 %v130_v20, %v29_v16 }
  0xd4   :  { %144 = vst.msk [vmem:[#allocation2] sm:$0xff] %vm22_vm0, %v139_v21  ;;  %146 = vst.msk [vmem:[#allocation2 + $0x10] sm:$0xff] %vm22_vm0, %v141_v22 }
  0xd9   :  { %v152_v25 = vld [vmem:[#allocation2 + $0x8] sm:$0xff]  ;;  %v154_v26 = vld [vmem:[#allocation2 + $0x18] sm:$0xff] }
  0xda   :  { %v163_v28 = vadd.f32 %v198_v23, %v152_v25  ;;  %v165_v29 = vadd.f32 %v198_v23, %v154_v26 }
  0xdb   :  { %v151_v31 = vld [vmem:[#allocation2] sm:$0xff]  ;;  %v153_v32 = vld [vmem:[#allocation2 + $0x10] sm:$0xff] }
  0xdc   :  { %v162_v34 = vadd.f32 %v198_v23, %v151_v31  ;;  %v164_v35 = vadd.f32 %v198_v23, %v153_v32  ;;  %v171_v36 = vadd.f32 %v167_v24, %v163_v28  ;;  %v173_v37 = vadd.f32 %v169_v27, %v165_v29 }
  0xde   :  { %v170_v38 = vadd.f32 %v166_v30, %v162_v34  ;;  %v172_v39 = vadd.f32 %v168_v33, %v164_v35  ;;  %175 = vst.msk [vmem:[#allocation3 + $0x8] sm:$0xff] %vm22_vm0, %v171_v36  ;;  %177 = vst.msk [vmem:[#allocation3 + $0x18] sm:$0xff] %vm22_vm0, %v173_v37 }
  0xe0   :  { %174 = vst.msk [vmem:[#allocation3] sm:$0xff] %vm22_vm0, %v170_v38  ;;  %176 = vst.msk [vmem:[#allocation3 + $0x10] sm:$0xff] %vm22_vm0, %v172_v39 }
  0xe1   :  { %254 = shalt.err (!%p251_p4)
}
  0xe2   :  { %s267_s3 = smov 128   ;;  %s268_s19 = smov 8  }
  0xe3   :  { %189 = dma.vmem_to_hbm [thread:$0]  %s184_s16, 512, %s358_s4, [#allocation4], %s267_s3, %s267_s3, %s268_s19  }
  0xe4   :  { %263 = dma.done.wait [#allocation4], 512  }
  0xe5   :  { %264 = vsyncadd [#allocation4], 4294966784 }
  0xe6   :  { %193 = vsyncpa [#allocation4], 1 }

// kernel: transformer_decoder_forward.12
= control target key start
LH: loop header
LB: loop body
LE: loop exit
PB: predicated region body
PF: predicated region fallthrough
CT: control target
= control target key end

     0   :  { %vm24_vm0 = vcmask 785408   ;;  %v421_v62 = vmov 0.0   ;;  %vm341_vm1 = vcmask 261120   ;;  %s657_s0 = inlined_call_operand.vmem [shape: f32[32,96], index: 0, kind: input, shape index: {}]   ;;  %s658_s3 = inlined_call_operand.vmem [shape: f32[96,288], index: 3, kind: input, shape index: {}]   ;;  %s659_s1 = inlined_call_operand.vmem [shape: f32[1,96], index: 1, kind: input, shape index: {}]   ;;  %s660_s2 = inlined_call_operand.vmem [shape: f32[1,96], index: 2, kind: input, shape index: {}]   ;;  %s661_s4 = inlined_call_operand.vmem [shape: f32[1,288], index: 4, kind: input, shape index: {}]   ;;  %s662_s5 = inlined_call_operand.vmem [shape: f32[32,288], index: 5, kind: output, shape index: {}]  }
   0x1   :  { %v20_v0 = vld [vmem:[%s657_s0] sm:$0xff]  ;;  %v22_v1 = vld [vmem:[%s657_s0 + $0x10] sm:$0xff]  ;;  %v21_v2 = vld [vmem:[%s657_s0 + $0x8] sm:$0xff]  ;;  %229 = vmatprep.mubr.f32.mxu0 %v421_v62 }
   0x2   :  { %v25_v3 = vsel %vm24_vm0, %v20_v0, 0.0  ;;  %v31_v4 = vsel %vm24_vm0, %v22_v1, 0.0  ;;  %v23_v5 = vld [vmem:[%s657_s0 + $0x18] sm:$0xff]  ;;  %v28_v6 = vsel %vm24_vm0, %v21_v2, 0.0  ;;  %v134_v28 = vld [vmem:[%s658_s3 + $0x110] sm:$0xff]  ;;  %v133_v29 = vld [vmem:[%s658_s3 + $0x108] sm:$0xff] }
   0x3   :  { %26 = vadd.xlane.f32.xlu0 %v25_v3  ;;  %32 = vadd.xlane.f32.xlu1 %v31_v4  ;;  %v34_v7 = vsel %vm24_vm0, %v23_v5, 0.0  ;;  %v131_v30 = vld [vmem:[%s658_s3 + $0xf8] sm:$0xff]  ;;  %v130_v31 = vld [vmem:[%s658_s3 + $0xf0] sm:$0xff]  ;;  %v128_v32 = vld [vmem:[%s658_s3 + $0xe0] sm:$0xff] }
   0x4   :  { %173 = vmatprep.subr.mxu0 %v134_v28  ;;  %v135_v33 = vld [vmem:[%s658_s3 + $0x118] sm:$0xff]  ;;  %v125_v35 = vld [vmem:[%s658_s3 + $0xc8] sm:$0xff]  ;;  %v132_v36 = vld [vmem:[%s658_s3 + $0x100] sm:$0xff] }
   0x5   :  { %174 = vmatpush1.msra.mxu0 %v133_v29  ;;  %382 = vmatprep.subr.mxu1 %v135_v33  ;;  %v127_v34 = vld [vmem:[%s658_s3 + $0xd8] sm:$0xff]  ;;  %v124_v37 = vld [vmem:[%s658_s3 + $0xc0] sm:$0xff]  ;;  %v122_v38 = vld [vmem:[%s658_s3 + $0xb0] sm:$0xff] }
   0x6   :  { %175 = vmatprep.subr.mxu0 %v131_v30  ;;  %383 = vmatpush3.msra.mxu1 %v135_v33  ;;  %v129_v39 = vld [vmem:[%s658_s3 + $0xe8] sm:$0xff]  ;;  %v119_v41 = vld [vmem:[%s658_s3 + $0x98] sm:$0xff]  ;;  %v126_v42 = vld [vmem:[%s658_s3 + $0xd0] sm:$0xff] }
   0x7   :  { %29 = vadd.xlane.f32.xlu0 %v28_v6  ;;  %35 = vadd.xlane.f32.xlu1 %v34_v7  ;;  %v121_v40 = vld [vmem:[%s658_s3 + $0xa8] sm:$0xff]  ;;  %v118_v43 = vld [vmem:[%s658_s3 + $0x90] sm:$0xff]  ;;  %v116_v44 = vld [vmem:[%s658_s3 + $0x80] sm:$0xff] }
   0x8   :  { %176 = vmatpush1.msra.mxu0 %v130_v31  ;;  %384 = vmatprep.subr.mxu1 %v132_v36  ;;  %v123_v45 = vld [vmem:[%s658_s3 + $0xb8] sm:$0xff]  ;;  %v113_v47 = vld [vmem:[%s658_s3 + $0x68] sm:$0xff]  ;;  %v120_v48 = vld [vmem:[%s658_s3 + $0xa0] sm:$0xff] }
   0x9   :  { %177 = vmatprep.subr.mxu0 %v128_v32  ;;  %385 = vmatpush3.msra.mxu1 %v132_v36  ;;  %v115_v46 = vld [vmem:[%s658_s3 + $0x78] sm:$0xff]  ;;  %v112_v49 = vld [vmem:[%s658_s3 + $0x60] sm:$0xff]  ;;  %v110_v50 = vld [vmem:[%s658_s3 + $0x50] sm:$0xff] }
   0xa   :  { %178 = vmatpush1.msra.mxu0 %v127_v34  ;;  %386 = vmatprep.subr.mxu1 %v129_v39  ;;  %v117_v51 = vld [vmem:[%s658_s3 + $0x88] sm:$0xff]  ;;  %v107_v53 = vld [vmem:[%s658_s3 + $0x38] sm:$0xff]  ;;  %v114_v54 = vld [vmem:[%s658_s3 + $0x70] sm:$0xff] }
   0xb   :  { %179 = vmatprep.subr.mxu0 %v125_v35  ;;  %387 = vmatpush3.msra.mxu1 %v129_v39  ;;  %v109_v52 = vld [vmem:[%s658_s3 + $0x48] sm:$0xff]  ;;  %v106_v55 = vld [vmem:[%s658_s3 + $0x30] sm:$0xff]  ;;  %v104_v56 = vld [vmem:[%s658_s3 + $0x20] sm:$0xff] }
   0xc   :  { %180 = vmatpush1.msra.mxu0 %v124_v37  ;;  %388 = vmatprep.subr.mxu1 %v126_v42  ;;  %v111_v57 = vld [vmem:[%s658_s3 + $0x58] sm:$0xff]  ;;  %v101_v59 = vld [vmem:[%s658_s3 + $0x8] sm:$0xff]  ;;  %v108_v60 = vld [vmem:[%s658_s3 + $0x40] sm:$0xff] }
   0xd   :  { %181 = vmatprep.subr.mxu0 %v122_v38  ;;  %389 = vmatpush3.msra.mxu1 %v126_v42  ;;  %v103_v58 = vld [vmem:[%s658_s3 + $0x18] sm:$0xff]  ;;  %v100_v61 = vld [vmem:[%s658_s3] sm:$0xff]  ;;  %v105_v63 = vld [vmem:[%s658_s3 + $0x28] sm:$0xff] }
   0xe   :  { %182 = vmatpush1.msra.mxu0 %v121_v40  ;;  %390 = vmatprep.subr.mxu1 %v123_v45  ;;  %v136_v34 = vld [vmem:[%s661_s4] sm:$0x7] }
   0xf   :  { %183 = vmatprep.subr.mxu0 %v119_v41  ;;  %391 = vmatpush3.msra.mxu1 %v123_v45 }
  0x10   :  { %184 = vmatpush1.msra.mxu0 %v118_v43  ;;  %392 = vmatprep.subr.mxu1 %v120_v48 }
  0x11   :  { %185 = vmatprep.subr.mxu0 %v116_v44  ;;  %393 = vmatpush3.msra.mxu1 %v120_v48 }
  0x12   :  { %186 = vmatpush1.msra.mxu0 %v115_v46  ;;  %394 = vmatprep.subr.mxu1 %v117_v51 }
  0x13   :  { %187 = vmatprep.subr.mxu0 %v113_v47  ;;  %395 = vmatpush3.msra.mxu1 %v117_v51 }
  0x14   :  { %188 = vmatpush1.msra.mxu0 %v112_v49  ;;  %396 = vmatprep.subr.mxu1 %v114_v54 }
  0x15   :  { %189 = vmatprep.subr.mxu0 %v110_v50  ;;  %397 = vmatpush3.msra.mxu1 %v114_v54 }
  0x16   :  { %190 = vmatpush1.msra.mxu0 %v109_v52  ;;  %398 = vmatprep.subr.mxu1 %v111_v57 }
  0x17   :  { %191 = vmatprep.subr.mxu0 %v107_v53  ;;  %399 = vmatpush3.msra.mxu1 %v111_v57 }
  0x18   :  { %192 = vmatpush1.msra.mxu0 %v106_v55  ;;  %400 = vmatprep.subr.mxu1 %v108_v60 }
  0x19   :  { %193 = vmatprep.subr.mxu0 %v104_v56  ;;  %401 = vmatpush3.msra.mxu1 %v108_v60 }
  0x1a   :  { %194 = vmatpush1.msra.mxu0 %v103_v58  ;;  %402 = vmatprep.subr.mxu1 %v105_v63 }
  0x1b   :  { %195 = vmatprep.subr.mxu0 %v101_v59  ;;  %403 = vmatpush3.msra.mxu1 %v105_v63 }
  0x1c   :  { %196 = vmatpush1.msra.mxu0 %v100_v61 }
  0x8c   :  { %v27_v8 = vpop.xlane.xlu0 %26  ;;  %v33_v9 = vpop.xlane.xlu1 %32 }
  0x8d   :  { %v38_v10 = vmul.f32 0.010416667, %v27_v8  ;;  %v40_v11 = vmul.f32 0.010416667, %v33_v9 }
  0x8f   :  { %v468_v12 = vsub.f32 %v20_v0, %v38_v10  ;;  %v470_v13 = vsub.f32 %v22_v1, %v40_v11  ;;  %v102_v0 = vld [vmem:[%s658_s3 + $0x10] sm:$0xff] }
  0x90   :  { %v30_v14 = vpop.xlane.xlu0 %29  ;;  %v36_v15 = vpop.xlane.xlu1 %35  ;;  %404 = vmatprep.subr.mxu1 %v102_v0 }
  0x91   :  { %v39_v16 = vmul.f32 0.010416667, %v30_v14  ;;  %v41_v17 = vmul.f32 0.010416667, %v36_v15  ;;  %v46_v18 = vmul.f32 %v468_v12, %v468_v12  ;;  %v48_v19 = vmul.f32 %v470_v13, %v470_v13  ;;  %405 = vmatpush3.msra.mxu1 %v102_v0 }
  0x93   :  { %v476_v20 = vsub.f32 %v21_v2, %v39_v16  ;;  %v478_v21 = vsub.f32 %v23_v5, %v41_v17  ;;  %v50_v22 = vsel %vm24_vm0, %v46_v18, 0.0  ;;  %v56_v23 = vsel %vm24_vm0, %v48_v19, 0.0  ;;  %v356_v16 = vld [vmem:[%s659_s1] ss:$0 sm:$0xff] }
  0x94   :  { %51 = vadd.xlane.f32.xlu0 %v50_v22  ;;  %v357_v18 = vld [vmem:[%s660_s2] ss:$0 sm:$0xff] }
  0x95   :  { %v47_v24 = vmul.f32 %v476_v20, %v476_v20  ;;  %v49_v25 = vmul.f32 %v478_v21, %v478_v21 }
  0x97   :  { %v53_v26 = vsel %vm24_vm0, %v47_v24, 0.0  ;;  %v59_v27 = vsel %vm24_vm0, %v49_v25, 0.0 }
  0x98   :  { %57 = vadd.xlane.f32.xlu0 %v56_v23  ;;  %54 = vadd.xlane.f32.xlu1 %v53_v26 }
  0x9c   :  { %60 = vadd.xlane.f32.xlu1 %v59_v27 }
 0x11d   :  { %v52_v1 = vpop.xlane.xlu0 %51 }
 0x11e   :  { %v62_v2 = vmul.f32 0.010416667, %v52_v1 }
 0x120   :  { %v66_v3 = vadd.f32 1e-05, %v62_v2 }
 0x121   :  { %v55_v4 = vpop.xlane.xlu1 %54  ;;  %v58_v5 = vpop.xlane.xlu0 %57 }
 0x122   :  { %413 = vrsqrt.f32 %v66_v3  ;;  %v63_v6 = vmul.f32 0.010416667, %v55_v4  ;;  %v64_v7 = vmul.f32 0.010416667, %v58_v5 }
 0x124   :  { %v67_v8 = vadd.f32 1e-05, %v63_v6  ;;  %v68_v9 = vadd.f32 1e-05, %v64_v7 }
 0x125   :  { %v61_v10 = vpop.xlane.xlu1 %60 }
 0x126   :  { %415 = vrsqrt.f32 %v67_v8  ;;  %v65_v11 = vmul.f32 0.010416667, %v61_v10 }
 0x127   :  { %417 = vrsqrt.f32 %v68_v9 }
 0x128   :  { %v69_v14 = vadd.f32 1e-05, %v65_v11 }
 0x12a   :  { %419 = vrsqrt.f32 %v69_v14 }
 0x12f   :  { %v414_v15 = vpop.eup %413 }
 0x130   :  { %v74_v17 = vmul.f32 %v414_v15, %v468_v12 }
 0x132   :  { %v85_v19 = vmul.f32 %v356_v16, %v74_v17 }
 0x133   :  { %v416_v22 = vpop.eup %415 }
 0x134   :  { %v418_v23 = vpop.eup %417  ;;  %v96_v24 = vadd.f32 %v357_v18, %v85_v19  ;;  %v75_v25 = vmul.f32 %v416_v22, %v476_v20  ;;  %v138_v20 = vlaneseq }
 0x135   :  { %v76_v26 = vmul.f32 %v418_v23, %v470_v13 }
 0x136   :  { %358 = vmatmul.mubr.msk.f32.vlgmr.msra.gmra.mxu0 %vm24_vm0, %v96_v24  ;;  %406 = vmatprep.mubr.msk.f32.mxu1 %vm24_vm0, %v96_v24  ;;  %v86_v27 = vmul.f32 %v356_v16, %v75_v25  ;;  %v139_v33 = vshrl.u32 %v138_v20, 7 }
 0x137   :  { %v420_v28 = vpop.eup %419  ;;  %235 = vmatprep.mubr.f32.mxu0 %v421_v62  ;;  %v87_v12 = vmul.f32 %v356_v16, %v76_v26 }
 0x138   :  { %v97_v29 = vadd.f32 %v357_v18, %v86_v27  ;;  %v77_v30 = vmul.f32 %v420_v28, %v478_v21  ;;  %v140_v21 = vsub.s32 0, %v139_v33  ;;  %v144_v35 = vsub.s32 1, %v139_v33 }
 0x139   :  { %v98_v31 = vadd.f32 %v357_v18, %v87_v12  ;;  %v148_v37 = vsub.s32 2, %v139_v33 }
 0x13a   :  { %359 = vmatmul.mubr.msk.f32.gmra.mxu0 %vm24_vm0, %v97_v29  ;;  %407 = vmatmul.mubr.msk.f32.vlgmr.msra.gmra.mxu1 %vm24_vm0, %v97_v29  ;;  %v88_v32 = vmul.f32 %v356_v16, %v77_v30  ;;  %v141_v36 = vrot.slane %v136_v34, %v140_v21  ;;  %v145_v38 = vrot.slane %v136_v34, %v144_v35 }
 0x13b   :  { %409 = vmatprep.mubr.msk.f32.mxu1 %vm24_vm0, %v98_v31  ;;  %241 = vmatprep.mubr.f32.mxu0 %v421_v62  ;;  %v149_v41 = vrot.slane %v136_v34, %v148_v37 }
 0x13c   :  { %v99_v13 = vadd.f32 %v357_v18, %v88_v32 }
 0x13e   :  { %360 = vmatmul.mubr.msk.f32.gmra.mxu0 %vm24_vm0, %v98_v31  ;;  %410 = vmatmul.mubr.msk.f32.gmra.mxu1 %vm24_vm0, %v99_v13 }
 0x13f   :  { %247 = vmatprep.mubr.f32.mxu0 %v421_v62 }
 0x142   :  { %361 = vmatmul.mubr.msk.f32.gmra.mxu0 %vm24_vm0, %v99_v13 }
 0x1f6   :  { %v231_v39 = vpop.f32.mrf.mxu0 }
 0x1f7   :  { %v232_v40 = vadd.f32 %v231_v39, %v141_v36 }
 0x1f8   :  { %v233_v42 = vpop.f32.mrf.mxu0 }
 0x1f9   :  { %339 = vst [vmem:[%s662_s5] sm:$0xff] %v232_v40  ;;  %v234_v43 = vadd.f32 %v233_v42, %v145_v38 }
 0x1fa   :  { %v237_v44 = vpop.f32.mrf.mxu0  ;;  %v408_v45 = vpop.f32.mrf.mxu1 }
 0x1fb   :  { %340 = vst [vmem:[%s662_s5 + $0x8] sm:$0xff] %v234_v43  ;;  %v238_v46 = vadd.f32 %v237_v44, %v141_v36  ;;  %v326_v47 = vadd.f32 %v408_v45, %v149_v41 }
 0x1fc   :  { %v239_v48 = vpop.f32.mrf.mxu0  ;;  %v320_v49 = vpop.f32.mrf.mxu1 }
 0x1fd   :  { %343 = vst [vmem:[%s662_s5 + $0x18] sm:$0xff] %v238_v46  ;;  %345 = vst.msk [vmem:[%s662_s5 + $0x28] sm:$0xff] %vm341_vm1, %v326_v47  ;;  %v240_v50 = vadd.f32 %v239_v48, %v145_v38  ;;  %v321_v51 = vadd.f32 %v320_v49, %v149_v41 }
 0x1fe   :  { %v243_v52 = vpop.f32.mrf.mxu0  ;;  %v411_v53 = vpop.f32.mrf.mxu1 }
 0x1ff   :  { %344 = vst [vmem:[%s662_s5 + $0x20] sm:$0xff] %v240_v50  ;;  %342 = vst.msk [vmem:[%s662_s5 + $0x10] sm:$0xff] %vm341_vm1, %v321_v51  ;;  %v244_v54 = vadd.f32 %v243_v52, %v141_v36  ;;  %v336_v55 = vadd.f32 %v411_v53, %v149_v41 }
 0x200   :  { %v245_v56 = vpop.f32.mrf.mxu0  ;;  %v330_v57 = vpop.f32.mrf.mxu1 }
 0x201   :  { %346 = vst [vmem:[%s662_s5 + $0x30] sm:$0xff] %v244_v54  ;;  %351 = vst.msk [vmem:[%s662_s5 + $0x58] sm:$0xff] %vm341_vm1, %v336_v55  ;;  %v246_v58 = vadd.f32 %v245_v56, %v145_v38  ;;  %v331_v59 = vadd.f32 %v330_v57, %v149_v41 }
 0x202   :  { %v249_v60 = vpop.f32.mrf.mxu0 }
 0x203   :  { %347 = vst [vmem:[%s662_s5 + $0x38] sm:$0xff] %v246_v58  ;;  %348 = vst.msk [vmem:[%s662_s5 + $0x40] sm:$0xff] %vm341_vm1, %v331_v59  ;;  %v250_v61 = vadd.f32 %v249_v60, %v141_v36 }
 0x204   :  { %v251_v62 = vpop.f32.mrf.mxu0 }
 0x205   :  { %349 = vst [vmem:[%s662_s5 + $0x48] sm:$0xff] %v250_v61  ;;  %v252_v63 = vadd.f32 %v251_v62, %v145_v38 }
 0x207   :  { %350 = vst [vmem:[%s662_s5 + $0x50] sm:$0xff] %v252_v63 }

</bundles_post_ra>
